<compile_context>
chip_gen: v7x
topology: tpu7x:2x2x1
jax: 0.10.0
libtpu: 0.0.40
codegen_flags: <defaults>
</compile_context>

<pallas_src>
import math
from functools import partial

import jax
import jax.numpy as jnp
from jax.experimental import pallas as pl
from jax.experimental.pallas import tpu as pltpu

MXU_DTYPE = jnp.bfloat16          # MXU operand dtype; all accumulation is fp32
LN_EPS = 1e-5                     # torch.nn.LayerNorm default

# Columns of the packed (D, _NUM_VEC) per-layer parameter slab.
(_SA_BO, _LN1_G, _LN1_B,
 _CA_BQ, _CA_BO, _LN2_G, _LN2_B,
 _FF_B2, _LN3_G, _LN3_B) = range(10)
_NUM_VEC = 10


# ---------------------------------------------------------------------------
# In-kernel helpers (values are VMEM-resident, feature-major: (features, tokens))
# ---------------------------------------------------------------------------

def _layernorm_cols(yT, gamma_col, beta_col):
    """LayerNorm over the feature (row) axis of a feature-major (D, S) slab."""
    mu = jnp.mean(yT, axis=0, keepdims=True)
    var = jnp.mean((yT - mu) ** 2, axis=0, keepdims=True)
    return (yT - mu) * jax.lax.rsqrt(var + LN_EPS) * gamma_col + beta_col


def _col(vec, idx):
    return vec[:, idx:idx + 1]    # (D, 1) column, broadcasts over tokens


# ---------------------------------------------------------------------------
# Fused decoder-stack kernel: grid = (batch, layer)
# ---------------------------------------------------------------------------

def decoder_stack_kernel(
        # data (per-batch / grid-invariant)
        x_ref, memT_ref, pe_ref, tmask_ref, mmask_ref,
        # per-layer weights (leading layer axis selected by index_map)
        sa_wqkv_ref, sa_bqkv_ref, sa_wo_ref,
        ca_wq_ref, ca_wkv_ref, ca_bkv_ref, ca_wo_ref,
        ff_w1_ref, ff_b1_ref, ff_w2_ref, vec_ref,
        # output + carried activation
        out_ref, xT_scr,
        *, n_heads):
    layer = pl.program_id(1)
    n_layers = pl.num_programs(1)
    d, st = xT_scr.shape                       # d_model, tgt seq len
    sm = memT_ref.shape[2]                     # memory seq len
    h = n_heads
    dk = d // h
    scale = 1.0 / math.sqrt(dk)

    # ---- layer 0: read tgt once, add positional encoding, go feature-major ----
    @pl.when(layer == 0)
    def _init():
        x0 = x_ref[0].astype(jnp.float32) + pe_ref[...]        # (St, D)
        xT_scr[...] = jnp.transpose(x0)                        # (D, St)

    xT = xT_scr[...]                                           # (D, St) fp32
    vec = vec_ref[0]                                           # (D, 10) fp32
    tmask = tmask_ref[...]                                     # (St, St) additive
    mmask = mmask_ref[...]                                     # (St, Sm) additive

    def mh_attention(qT, kT, vT, mask, s_kv):
        # qT: (D, St), kT/vT: (D, s_kv) fp32.  Head split is a sublane-group
        # reshape (last dim untouched -> no lane shuffles); only Q needs one small
        # batched last-two-dims transpose to reach the canonical matmul form.
        qTh = qT.reshape(h, dk, st)
        kTh = kT.reshape(h, dk, s_kv)
        vTh = vT.reshape(h, dk, s_kv)
        qh = jnp.transpose(qTh, (0, 2, 1)).astype(MXU_DTYPE)   # (h, St, dk)
        s = jnp.einsum('hqd,hdk->hqk', qh, kTh.astype(MXU_DTYPE),
                       preferred_element_type=jnp.float32)
        s = s * scale + mask[None, :, :]
        s = s - jnp.max(s, axis=-1, keepdims=True)             # fp32 softmax
        p = jnp.exp(s)
        p = p * pl.reciprocal(jnp.sum(p, axis=-1, keepdims=True), approx=True)
        # context, kept feature-major: ctxT[h,d,q] = sum_k vT[h,d,k] * p[h,q,k]
        ctxT = jnp.einsum('hdk,hqk->hdq', vTh.astype(MXU_DTYPE),
                          p.astype(MXU_DTYPE),
                          preferred_element_type=jnp.float32)
        return ctxT.reshape(d, st)                             # free head merge

    # ---- self attention + residual + LayerNorm --------------------------------
    qkvT = jnp.dot(sa_wqkv_ref[0], xT.astype(MXU_DTYPE),
                   preferred_element_type=jnp.float32) + sa_bqkv_ref[0]
    ctxT = mh_attention(qkvT[:d], qkvT[d:2 * d], qkvT[2 * d:], tmask, st)
    oT = jnp.dot(sa_wo_ref[0], ctxT.astype(MXU_DTYPE),
                 preferred_element_type=jnp.float32) + _col(vec, _SA_BO)
    xT = _layernorm_cols(xT + oT, _col(vec, _LN1_G), _col(vec, _LN1_B))

    # ---- encoder-decoder attention + residual + LayerNorm ---------------------
    memT = memT_ref[0]                                         # (D, Sm) bf16
    qT = jnp.dot(ca_wq_ref[0], xT.astype(MXU_DTYPE),
                 preferred_element_type=jnp.float32) + _col(vec, _CA_BQ)
    kvT = jnp.dot(ca_wkv_ref[0], memT,
                  preferred_element_type=jnp.float32) + ca_bkv_ref[0]
    ctxT = mh_attention(qT, kvT[:d], kvT[d:], mmask, sm)
    oT = jnp.dot(ca_wo_ref[0], ctxT.astype(MXU_DTYPE),
                 preferred_element_type=jnp.float32) + _col(vec, _CA_BO)
    xT = _layernorm_cols(xT + oT, _col(vec, _LN2_G), _col(vec, _LN2_B))

    # ---- position-wise FFN + residual + LayerNorm ------------------------------
    hT = jnp.dot(ff_w1_ref[0], xT.astype(MXU_DTYPE),
                 preferred_element_type=jnp.float32) + ff_b1_ref[0]
    hT = jnp.maximum(hT, 0.0)
    yT = jnp.dot(ff_w2_ref[0], hT.astype(MXU_DTYPE),
                 preferred_element_type=jnp.float32) + _col(vec, _FF_B2)
    xT = _layernorm_cols(xT + yT, _col(vec, _LN3_G), _col(vec, _LN3_B))

    # carry for the next layer; last layer writes the HBM output block once
    xT_scr[...] = xT

    @pl.when(layer == n_layers - 1)
    def _finalize():
        out_ref[0] = jnp.transpose(xT).astype(out_ref.dtype)   # back to (St, D)


# ---------------------------------------------------------------------------
# pallas_call wrapper (keeps the standard (B, S, D) external interface)
# ---------------------------------------------------------------------------

def decoder_forward(tgt, memory, params, n_heads, tgt_mask, memory_mask):
    B, St, D = tgt.shape
    Sm = memory.shape[1]
    L = params["sa_wqkv"].shape[0]
    Dff = params["ff_w1"].shape[1]
    assert D % n_heads == 0

    pe = _positional_encoding(St, D)
    # encoder memory: bf16 + feature-major once outside (one fused XLA op, half DMA)
    memT = jnp.transpose(memory.astype(MXU_DTYPE), (0, 2, 1))          # (B, D, Sm)

    def inv(shape):        # grid-invariant block: fetched once, stays VMEM-resident
        return pl.BlockSpec(shape, lambda b, l: (0,) * len(shape))

    def per_layer(shape):  # one block per layer; the default double buffering is
        return pl.BlockSpec(  # what hides the layer l+1 weight DMA under layer l
            shape, lambda b, l: (l,) + (0,) * (len(shape) - 1))

    in_specs = [
        pl.BlockSpec((1, St, D), lambda b, l: (b, 0, 0)),      # tgt (read at l == 0)
        pl.BlockSpec((1, D, Sm), lambda b, l: (b, 0, 0)),      # memory^T (bf16)
        inv((St, D)),                                          # positional encoding
        inv((St, St)),                                         # tgt additive mask
        inv((St, Sm)),                                         # memory additive mask
        per_layer((1, 3 * D, D)),                              # self-attn W_qkv
        per_layer((1, 3 * D, 1)),                              # self-attn b_qkv
        per_layer((1, D, D)),                                  # self-attn W_o
        per_layer((1, D, D)),                                  # cross-attn W_q
        per_layer((1, 2 * D, D)),                              # cross-attn W_kv
        per_layer((1, 2 * D, 1)),                              # cross-attn b_kv
        per_layer((1, D, D)),                                  # cross-attn W_o
        per_layer((1, Dff, D)),                                # FFN fc1 W
        per_layer((1, Dff, 1)),                                # FFN fc1 b
        per_layer((1, D, Dff)),                                # FFN fc2 W
        per_layer((1, D, _NUM_VEC)),                           # packed biases + LN
    ]

    return pl.pallas_call(
        partial(decoder_stack_kernel, n_heads=n_heads),
        out_shape=jax.ShapeDtypeStruct((B, St, D), tgt.dtype),
        grid=(B, L),
        in_specs=in_specs,
        out_specs=pl.BlockSpec((1, St, D), lambda b, l: (b, 0, 0)),
        scratch_shapes=[pltpu.VMEM((D, St), jnp.float32)],     # carried activation
        compiler_params=pltpu.CompilerParams(
            dimension_semantics=("parallel", "arbitrary"),
            vmem_limit_bytes=32 * 1024 * 1024),
    )(tgt, memT, pe, tgt_mask, memory_mask,
      params["sa_wqkv"], params["sa_bqkv"], params["sa_wo"],
      params["ca_wq"], params["ca_wkv"], params["ca_bkv"], params["ca_wo"],
      params["ff_w1"], params["ff_b1"], params["ff_w2"], params["vec"])


# ---------------------------------------------------------------------------
# Parameter init (PyTorch-default uniform; weights kept (out, in), stacked over L)
# ---------------------------------------------------------------------------

def _linear_init(key, fan_in, fan_out):
    kw, kb = jax.random.split(key)
    bound = 1.0 / math.sqrt(fan_in)
    w = jax.random.uniform(kw, (fan_out, fan_in), jnp.float32, -bound, bound)
    b = jax.random.uniform(kb, (fan_out,), jnp.float32, -bound, bound)
    return w, b


def init_decoder_params(key, d_model, n_layers, d_ff):
    D, Dff = d_model, d_ff
    names = ("sa_wqkv", "sa_bqkv", "sa_wo", "ca_wq", "ca_wkv", "ca_bkv",
             "ca_wo", "ff_w1", "ff_b1", "ff_w2", "vec")
    acc = {k: [] for k in names}
    ones = jnp.ones((D,), jnp.float32)
    zeros = jnp.zeros((D,), jnp.float32)
    for lk in jax.random.split(key, n_layers):
        ks = jax.random.split(lk, 10)
        wq, bq = _linear_init(ks[0], D, D)       # self-attn
        wk, bk = _linear_init(ks[1], D, D)
        wv, bv = _linear_init(ks[2], D, D)
        wo, bo = _linear_init(ks[3], D, D)
        cq, cbq = _linear_init(ks[4], D, D)      # cross-attn
        ck, cbk = _linear_init(ks[5], D, D)
        cv, cbv = _linear_init(ks[6], D, D)
        co, cbo = _linear_init(ks[7], D, D)
        w1, b1 = _linear_init(ks[8], D, Dff)     # FFN
        w2, b2 = _linear_init(ks[9], Dff, D)
        acc["sa_wqkv"].append(jnp.concatenate([wq, wk, wv], axis=0))
        acc["sa_bqkv"].append(jnp.concatenate([bq, bk, bv])[:, None])
        acc["sa_wo"].append(wo)
        acc["ca_wq"].append(cq)
        acc["ca_wkv"].append(jnp.concatenate([ck, cv], axis=0))
        acc["ca_bkv"].append(jnp.concatenate([cbk, cbv])[:, None])
        acc["ca_wo"].append(co)
        acc["ff_w1"].append(w1)
        acc["ff_b1"].append(b1[:, None])
        acc["ff_w2"].append(w2)
        # packed columns: sa_bo, ln1_g, ln1_b, ca_bq, ca_bo, ln2_g, ln2_b,
        #                 ff_b2, ln3_g, ln3_b
        acc["vec"].append(jnp.stack([bo, ones, zeros, cbq, cbo, ones, zeros,
                                     b2, ones, zeros], axis=1))
    params = {k: jnp.stack(v) for k, v in acc.items()}
    for k in ("sa_wqkv", "sa_wo", "ca_wq", "ca_wkv", "ca_wo", "ff_w1", "ff_w2"):
        params[k] = params[k].astype(MXU_DTYPE)                 # bf16 MXU operands
    return params


def _positional_encoding(seq_len, d_model):
    pos = jnp.arange(seq_len, dtype=jnp.float32)[:, None]
    div = jnp.exp(jnp.arange(0, d_model, 2, dtype=jnp.float32)
                  * (-math.log(10000.0) / d_model))
    pe = jnp.zeros((seq_len, d_model), jnp.float32)
    pe = pe.at[:, 0::2].set(jnp.sin(pos * div))
    pe = pe.at[:, 1::2].set(jnp.cos(pos * div))
    return pe


# ---------------------------------------------------------------------------
# Main
# ---------------------------------------------------------------------------

if __name__ == "__main__":
    B, S_tgt, S_mem = 2, 8, 8
    d_model, n_heads, d_ff, n_layers = 32, 4, 64, 2

    key = jax.random.PRNGKey(0)
    k_tgt, k_mem, k_par = jax.random.split(key, 3)

    tgt = jax.random.normal(k_tgt, (B, S_tgt, d_model), jnp.float32)
    memory = jax.random.normal(k_mem, (B, S_mem, d_model), jnp.float32)

    # additive masks (added to attention scores before softmax, as in the module)
    tgt_mask = jnp.where(jnp.triu(jnp.ones((S_tgt, S_tgt), jnp.float32), 1) > 0,
                         -1e9, 0.0).astype(jnp.float32)
    memory_mask = jnp.zeros((S_tgt, S_mem), jnp.float32)

    params = init_decoder_params(k_par, d_model, n_layers, d_ff)

    out = decoder_forward(tgt, memory, params, n_heads, tgt_mask, memory_mask)
    out = jax.block_until_ready(out)
    assert out.shape == (B, S_tgt, d_model)
    assert bool(jnp.isfinite(out).all())
    print("KERNEL_OK")
</pallas_src>

<mosaic_0001>
module attributes {stable_mosaic.version = 11 : i64} {
  func.func @decoder_stack_kernel(%arg0: i32, %arg1: i32, %arg2: memref<1x8x32xf32, #tpu.memory_space<vmem>>, %arg3: memref<1x32x8xbf16, #tpu.memory_space<vmem>>, %arg4: memref<8x32xf32, #tpu.memory_space<vmem>>, %arg5: memref<8x8xf32, #tpu.memory_space<vmem>>, %arg6: memref<8x8xf32, #tpu.memory_space<vmem>>, %arg7: memref<1x96x32xbf16, #tpu.memory_space<vmem>>, %arg8: memref<1x96x1xf32, #tpu.memory_space<vmem>>, %arg9: memref<1x32x32xbf16, #tpu.memory_space<vmem>>, %arg10: memref<1x32x32xbf16, #tpu.memory_space<vmem>>, %arg11: memref<1x64x32xbf16, #tpu.memory_space<vmem>>, %arg12: memref<1x64x1xf32, #tpu.memory_space<vmem>>, %arg13: memref<1x32x32xbf16, #tpu.memory_space<vmem>>, %arg14: memref<1x64x32xbf16, #tpu.memory_space<vmem>>, %arg15: memref<1x64x1xf32, #tpu.memory_space<vmem>>, %arg16: memref<1x32x64xbf16, #tpu.memory_space<vmem>>, %arg17: memref<1x32x10xf32, #tpu.memory_space<vmem>>, %arg18: memref<1x8x32xf32, #tpu.memory_space<vmem>>, %arg19: memref<32x8xf32, #tpu.memory_space<vmem>>) attributes {dimension_semantics = [#tpu.dimension_semantics<parallel>, #tpu.dimension_semantics<arbitrary>], iteration_bounds = array<i64: 2, 2>, scalar_prefetch = 0 : i64, scratch_operands = 1 : i64, tpu.core_type = #tpu.core_type<tc>, window_params = [{transform_indices = @transform_0, window_bounds = array<i64: 1, 8, 32>}, {transform_indices = @transform_1, window_bounds = array<i64: 1, 32, 8>}, {pipeline_mode = #tpu.pipeline_mode<synchronous>, transform_indices = @transform_2, window_bounds = array<i64: 8, 32>}, {pipeline_mode = #tpu.pipeline_mode<synchronous>, transform_indices = @transform_3, window_bounds = array<i64: 8, 8>}, {pipeline_mode = #tpu.pipeline_mode<synchronous>, transform_indices = @transform_4, window_bounds = array<i64: 8, 8>}, {transform_indices = @transform_5, window_bounds = array<i64: 1, 96, 32>}, {transform_indices = @transform_6, window_bounds = array<i64: 1, 96, 1>}, {transform_indices = @transform_7, window_bounds = array<i64: 1, 32, 32>}, {transform_indices = @transform_8, window_bounds = array<i64: 1, 32, 32>}, {transform_indices = @transform_9, window_bounds = array<i64: 1, 64, 32>}, {transform_indices = @transform_10, window_bounds = array<i64: 1, 64, 1>}, {transform_indices = @transform_11, window_bounds = array<i64: 1, 32, 32>}, {transform_indices = @transform_12, window_bounds = array<i64: 1, 64, 32>}, {transform_indices = @transform_13, window_bounds = array<i64: 1, 64, 1>}, {transform_indices = @transform_14, window_bounds = array<i64: 1, 32, 64>}, {transform_indices = @transform_15, window_bounds = array<i64: 1, 32, 10>}, {transform_indices = @transform_16, window_bounds = array<i64: 1, 8, 32>}]} {
    %c0_i32 = arith.constant 0 : i32
    %0 = arith.cmpi eq, %arg1, %c0_i32 : i32
    %1 = arith.extui %0 : i1 to i32
    %c0_i32_0 = arith.constant 0 : i32
    %2 = arith.cmpi ne, %1, %c0_i32_0 : i32
    scf.if %2 {
      %c0_77 = arith.constant 0 : index
      %c0_78 = arith.constant 0 : index
      %c0_79 = arith.constant 0 : index
      %199 = vector.load %arg2[%c0_77, %c0_78, %c0_79] : memref<1x8x32xf32, #tpu.memory_space<vmem>>, vector<1x8x32xf32>
      %200 = vector.shape_cast %199 : vector<1x8x32xf32> to vector<8x32xf32>
      %c0_80 = arith.constant 0 : index
      %c0_81 = arith.constant 0 : index
      %201 = vector.load %arg4[%c0_80, %c0_81] : memref<8x32xf32, #tpu.memory_space<vmem>>, vector<8x32xf32>
      %202 = arith.addf %200, %201 : vector<8x32xf32>
      %203 = tpu.transpose %202, [1, 0] : vector<8x32xf32> -> vector<32x8xf32>
      %c0_82 = arith.constant 0 : index
      %c0_83 = arith.constant 0 : index
      %204 = vector.load %arg19[%c0_82, %c0_83] : memref<32x8xf32, #tpu.memory_space<vmem>>, vector<32x8xf32>
      tpu.vector_store %arg19[%c0_82, %c0_83], %203 {strides = array<i32>} : memref<32x8xf32, #tpu.memory_space<vmem>>, vector<32x8xf32>,
    } else {
    }
    %c0 = arith.constant 0 : index
    %c0_1 = arith.constant 0 : index
    %3 = vector.load %arg19[%c0, %c0_1] : memref<32x8xf32, #tpu.memory_space<vmem>>, vector<32x8xf32>
    %c0_2 = arith.constant 0 : index
    %c0_3 = arith.constant 0 : index
    %c0_4 = arith.constant 0 : index
    %4 = vector.load %arg17[%c0_2, %c0_3, %c0_4] : memref<1x32x10xf32, #tpu.memory_space<vmem>>, vector<1x32x10xf32>
    %5 = vector.shape_cast %4 : vector<1x32x10xf32> to vector<32x10xf32>
    %c0_5 = arith.constant 0 : index
    %c0_6 = arith.constant 0 : index
    %6 = vector.load %arg5[%c0_5, %c0_6] : memref<8x8xf32, #tpu.memory_space<vmem>>, vector<8x8xf32>
    %c0_7 = arith.constant 0 : index
    %c0_8 = arith.constant 0 : index
    %7 = vector.load %arg6[%c0_7, %c0_8] : memref<8x8xf32, #tpu.memory_space<vmem>>, vector<8x8xf32>
    %c0_9 = arith.constant 0 : index
    %c0_10 = arith.constant 0 : index
    %c0_11 = arith.constant 0 : index
    %8 = vector.load %arg7[%c0_9, %c0_10, %c0_11] : memref<1x96x32xbf16, #tpu.memory_space<vmem>>, vector<1x96x32xbf16>
    %9 = vector.shape_cast %8 : vector<1x96x32xbf16> to vector<96x32xbf16>
    %10 = arith.truncf %3 : vector<32x8xf32> to vector<32x8xbf16>
    %cst = arith.constant dense<0.000000e+00> : vector<96x8xf32>
    %11 = tpu.matmul %9, %10, %cst {dimension_numbers = #tpu.dot_dimension_numbers<[1], [0], [0], [1], [0, 0, 1, 1], [], []>} : vector<96x32xbf16>, vector<32x8xbf16>, vector<96x8xf32> -> vector<96x8xf32>
    %c0_12 = arith.constant 0 : index
    %c0_13 = arith.constant 0 : index
    %c0_14 = arith.constant 0 : index
    %12 = vector.load %arg8[%c0_12, %c0_13, %c0_14] : memref<1x96x1xf32, #tpu.memory_space<vmem>>, vector<1x96x1xf32>
    %13 = vector.shape_cast %12 : vector<1x96x1xf32> to vector<96x1xf32>
    %14 = vector.broadcast %13 : vector<96x1xf32> to vector<96x8xf32>
    %15 = arith.addf %11, %14 : vector<96x8xf32>
    %16 = vector.extract_strided_slice %15 {offsets = [0, 0], sizes = [32, 8], strides = [1, 1]} : vector<96x8xf32> to vector<32x8xf32>
    %17 = vector.extract_strided_slice %15 {offsets = [32, 0], sizes = [32, 8], strides = [1, 1]} : vector<96x8xf32> to vector<32x8xf32>
    %18 = vector.extract_strided_slice %15 {offsets = [64, 0], sizes = [32, 8], strides = [1, 1]} : vector<96x8xf32> to vector<32x8xf32>
    %19 = vector.shape_cast %16 : vector<32x8xf32> to vector<4x8x8xf32>
    %20 = vector.shape_cast %17 : vector<32x8xf32> to vector<4x8x8xf32>
    %21 = vector.shape_cast %18 : vector<32x8xf32> to vector<4x8x8xf32>
    %22 = tpu.transpose %19, [0, 2, 1] : vector<4x8x8xf32> -> vector<4x8x8xf32>
    %23 = arith.truncf %22 : vector<4x8x8xf32> to vector<4x8x8xbf16>
    %24 = arith.truncf %20 : vector<4x8x8xf32> to vector<4x8x8xbf16>
    "tpu.trace_start"() <{level = 10 : i32, message = "hqd,hdk->hqk"}> : () -> ()
    %cst_15 = arith.constant dense<0.000000e+00> : vector<4x8x8xf32>
    %25 = tpu.matmul %23, %24, %cst_15 {dimension_numbers = #tpu.dot_dimension_numbers<[2], [1], [1], [2], [0, 0, 0, 1, 1, 2], [0], [0]>} : vector<4x8x8xbf16>, vector<4x8x8xbf16>, vector<4x8x8xf32> -> vector<4x8x8xf32>
    "tpu.trace_stop"() : () -> ()
    %cst_16 = arith.constant 0.353553385 : f32
    %26 = vector.broadcast %cst_16 : f32 to vector<4x8x8xf32>
    %27 = arith.mulf %25, %26 : vector<4x8x8xf32>
    %28 = vector.shape_cast %6 : vector<8x8xf32> to vector<1x8x8xf32>
    %29 = vector.broadcast %28 : vector<1x8x8xf32> to vector<4x8x8xf32>
    %30 = arith.addf %27, %29 : vector<4x8x8xf32>
    %cst_17 = arith.constant dense<0xFF800000> : vector<4x8xf32>
    %31 = vector.multi_reduction <maximumf>, %30, %cst_17 [2] : vector<4x8x8xf32> to vector<4x8xf32>
    %32 = vector.shape_cast %31 : vector<4x8xf32> to vector<4x8x1xf32>
    %33 = vector.broadcast %32 : vector<4x8x1xf32> to vector<4x8x8xf32>
    %34 = arith.subf %30, %33 : vector<4x8x8xf32>
    %35 = math.exp %34 : vector<4x8x8xf32>
    %cst_18 = arith.constant dense<0.000000e+00> : vector<4x8xf32>
    %36 = vector.multi_reduction <add>, %35, %cst_18 [2] : vector<4x8x8xf32> to vector<4x8xf32>
    %37 = vector.shape_cast %36 : vector<4x8xf32> to vector<4x8x1xf32>
    %38 = tpu.reciprocal %37 {approx = true} : vector<4x8x1xf32> -> vector<4x8x1xf32>
    %39 = vector.broadcast %38 : vector<4x8x1xf32> to vector<4x8x8xf32>
    %40 = arith.mulf %35, %39 : vector<4x8x8xf32>
    %41 = arith.truncf %21 : vector<4x8x8xf32> to vector<4x8x8xbf16>
    %42 = arith.truncf %40 : vector<4x8x8xf32> to vector<4x8x8xbf16>
    "tpu.trace_start"() <{level = 10 : i32, message = "hdk,hqk->hdq"}> : () -> ()
    %cst_19 = arith.constant dense<0.000000e+00> : vector<4x8x8xf32>
    %43 = tpu.matmul %41, %42, %cst_19 {dimension_numbers = #tpu.dot_dimension_numbers<[2], [2], [1], [1], [0, 0, 0, 1, 1, 1], [0], [0]>} : vector<4x8x8xbf16>, vector<4x8x8xbf16>, vector<4x8x8xf32> -> vector<4x8x8xf32>
    "tpu.trace_stop"() : () -> ()
    %44 = vector.shape_cast %43 : vector<4x8x8xf32> to vector<32x8xf32>
    %c0_20 = arith.constant 0 : index
    %c0_21 = arith.constant 0 : index
    %c0_22 = arith.constant 0 : index
    %45 = vector.load %arg9[%c0_20, %c0_21, %c0_22] : memref<1x32x32xbf16, #tpu.memory_space<vmem>>, vector<1x32x32xbf16>
    %46 = vector.shape_cast %45 : vector<1x32x32xbf16> to vector<32x32xbf16>
    %47 = arith.truncf %44 : vector<32x8xf32> to vector<32x8xbf16>
    %cst_23 = arith.constant dense<0.000000e+00> : vector<32x8xf32>
    %48 = tpu.matmul %46, %47, %cst_23 {dimension_numbers = #tpu.dot_dimension_numbers<[1], [0], [0], [1], [0, 0, 1, 1], [], []>} : vector<32x32xbf16>, vector<32x8xbf16>, vector<32x8xf32> -> vector<32x8xf32>
    %49 = vector.extract_strided_slice %5 {offsets = [0, 0], sizes = [32, 1], strides = [1, 1]} : vector<32x10xf32> to vector<32x1xf32>
    %50 = vector.broadcast %49 : vector<32x1xf32> to vector<32x8xf32>
    %51 = arith.addf %48, %50 : vector<32x8xf32>
    %52 = arith.addf %3, %51 : vector<32x8xf32>
    %53 = vector.extract_strided_slice %5 {offsets = [0, 1], sizes = [32, 1], strides = [1, 1]} : vector<32x10xf32> to vector<32x1xf32>
    %54 = vector.extract_strided_slice %5 {offsets = [0, 2], sizes = [32, 1], strides = [1, 1]} : vector<32x10xf32> to vector<32x1xf32>
    %cst_24 = arith.constant dense<0.000000e+00> : vector<8xf32>
    %55 = vector.multi_reduction <add>, %52, %cst_24 [0] : vector<32x8xf32> to vector<8xf32>
    %56 = vector.shape_cast %55 : vector<8xf32> to vector<1x8xf32>
    %cst_25 = arith.constant 3.200000e+01 : f32
    %57 = vector.broadcast %cst_25 : f32 to vector<1x8xf32>
    %58 = arith.divf %56, %57 : vector<1x8xf32>
    %59 = vector.broadcast %58 : vector<1x8xf32> to vector<32x8xf32>
    %60 = arith.subf %52, %59 : vector<32x8xf32>
    %61 = arith.mulf %60, %60 : vector<32x8xf32>
    %cst_26 = arith.constant dense<0.000000e+00> : vector<8xf32>
    %62 = vector.multi_reduction <add>, %61, %cst_26 [0] : vector<32x8xf32> to vector<8xf32>
    %63 = vector.shape_cast %62 : vector<8xf32> to vector<1x8xf32>
    %cst_27 = arith.constant 3.200000e+01 : f32
    %64 = vector.broadcast %cst_27 : f32 to vector<1x8xf32>
    %65 = arith.divf %63, %64 : vector<1x8xf32>
    %66 = vector.broadcast %58 : vector<1x8xf32> to vector<32x8xf32>
    %67 = arith.subf %52, %66 : vector<32x8xf32>
    %cst_28 = arith.constant 9.99999974E-6 : f32
    %68 = vector.broadcast %cst_28 : f32 to vector<1x8xf32>
    %69 = arith.addf %65, %68 : vector<1x8xf32>
    %70 = math.rsqrt %69 : vector<1x8xf32>
    %71 = vector.broadcast %70 : vector<1x8xf32> to vector<32x8xf32>
    %72 = arith.mulf %67, %71 : vector<32x8xf32>
    %73 = vector.broadcast %53 : vector<32x1xf32> to vector<32x8xf32>
    %74 = arith.mulf %72, %73 : vector<32x8xf32>
    %75 = vector.broadcast %54 : vector<32x1xf32> to vector<32x8xf32>
    %76 = arith.addf %74, %75 : vector<32x8xf32>
    %c0_29 = arith.constant 0 : index
    %c0_30 = arith.constant 0 : index
    %c0_31 = arith.constant 0 : index
    %77 = vector.load %arg3[%c0_29, %c0_30, %c0_31] : memref<1x32x8xbf16, #tpu.memory_space<vmem>>, vector<1x32x8xbf16>
    %78 = vector.shape_cast %77 : vector<1x32x8xbf16> to vector<32x8xbf16>
    %c0_32 = arith.constant 0 : index
    %c0_33 = arith.constant 0 : index
    %c0_34 = arith.constant 0 : index
    %79 = vector.load %arg10[%c0_32, %c0_33, %c0_34] : memref<1x32x32xbf16, #tpu.memory_space<vmem>>, vector<1x32x32xbf16>
    %80 = vector.shape_cast %79 : vector<1x32x32xbf16> to vector<32x32xbf16>
    %81 = arith.truncf %76 : vector<32x8xf32> to vector<32x8xbf16>
    %cst_35 = arith.constant dense<0.000000e+00> : vector<32x8xf32>
    %82 = tpu.matmul %80, %81, %cst_35 {dimension_numbers = #tpu.dot_dimension_numbers<[1], [0], [0], [1], [0, 0, 1, 1], [], []>} : vector<32x32xbf16>, vector<32x8xbf16>, vector<32x8xf32> -> vector<32x8xf32>
    %83 = vector.extract_strided_slice %5 {offsets = [0, 3], sizes = [32, 1], strides = [1, 1]} : vector<32x10xf32> to vector<32x1xf32>
    %84 = vector.broadcast %83 : vector<32x1xf32> to vector<32x8xf32>
    %85 = arith.addf %82, %84 : vector<32x8xf32>
    %c0_36 = arith.constant 0 : index
    %c0_37 = arith.constant 0 : index
    %c0_38 = arith.constant 0 : index
    %86 = vector.load %arg11[%c0_36, %c0_37, %c0_38] : memref<1x64x32xbf16, #tpu.memory_space<vmem>>, vector<1x64x32xbf16>
    %87 = vector.shape_cast %86 : vector<1x64x32xbf16> to vector<64x32xbf16>
    %cst_39 = arith.constant dense<0.000000e+00> : vector<64x8xf32>
    %88 = tpu.matmul %87, %78, %cst_39 {dimension_numbers = #tpu.dot_dimension_numbers<[1], [0], [0], [1], [0, 0, 1, 1], [], []>} : vector<64x32xbf16>, vector<32x8xbf16>, vector<64x8xf32> -> vector<64x8xf32>
    %c0_40 = arith.constant 0 : index
    %c0_41 = arith.constant 0 : index
    %c0_42 = arith.constant 0 : index
    %89 = vector.load %arg12[%c0_40, %c0_41, %c0_42] : memref<1x64x1xf32, #tpu.memory_space<vmem>>, vector<1x64x1xf32>
    %90 = vector.shape_cast %89 : vector<1x64x1xf32> to vector<64x1xf32>
    %91 = vector.broadcast %90 : vector<64x1xf32> to vector<64x8xf32>
    %92 = arith.addf %88, %91 : vector<64x8xf32>
    %93 = vector.extract_strided_slice %92 {offsets = [0, 0], sizes = [32, 8], strides = [1, 1]} : vector<64x8xf32> to vector<32x8xf32>
    %94 = vector.extract_strided_slice %92 {offsets = [32, 0], sizes = [32, 8], strides = [1, 1]} : vector<64x8xf32> to vector<32x8xf32>
    %95 = vector.shape_cast %85 : vector<32x8xf32> to vector<4x8x8xf32>
    %96 = vector.shape_cast %93 : vector<32x8xf32> to vector<4x8x8xf32>
    %97 = vector.shape_cast %94 : vector<32x8xf32> to vector<4x8x8xf32>
    %98 = tpu.transpose %95, [0, 2, 1] : vector<4x8x8xf32> -> vector<4x8x8xf32>
    %99 = arith.truncf %98 : vector<4x8x8xf32> to vector<4x8x8xbf16>
    %100 = arith.truncf %96 : vector<4x8x8xf32> to vector<4x8x8xbf16>
    "tpu.trace_start"() <{level = 10 : i32, message = "hqd,hdk->hqk"}> : () -> ()
    %cst_43 = arith.constant dense<0.000000e+00> : vector<4x8x8xf32>
    %101 = tpu.matmul %99, %100, %cst_43 {dimension_numbers = #tpu.dot_dimension_numbers<[2], [1], [1], [2], [0, 0, 0, 1, 1, 2], [0], [0]>} : vector<4x8x8xbf16>, vector<4x8x8xbf16>, vector<4x8x8xf32> -> vector<4x8x8xf32>
    "tpu.trace_stop"() : () -> ()
    %cst_44 = arith.constant 0.353553385 : f32
    %102 = vector.broadcast %cst_44 : f32 to vector<4x8x8xf32>
    %103 = arith.mulf %101, %102 : vector<4x8x8xf32>
    %104 = vector.shape_cast %7 : vector<8x8xf32> to vector<1x8x8xf32>
    %105 = vector.broadcast %104 : vector<1x8x8xf32> to vector<4x8x8xf32>
    %106 = arith.addf %103, %105 : vector<4x8x8xf32>
    %cst_45 = arith.constant dense<0xFF800000> : vector<4x8xf32>
    %107 = vector.multi_reduction <maximumf>, %106, %cst_45 [2] : vector<4x8x8xf32> to vector<4x8xf32>
    %108 = vector.shape_cast %107 : vector<4x8xf32> to vector<4x8x1xf32>
    %109 = vector.broadcast %108 : vector<4x8x1xf32> to vector<4x8x8xf32>
    %110 = arith.subf %106, %109 : vector<4x8x8xf32>
    %111 = math.exp %110 : vector<4x8x8xf32>
    %cst_46 = arith.constant dense<0.000000e+00> : vector<4x8xf32>
    %112 = vector.multi_reduction <add>, %111, %cst_46 [2] : vector<4x8x8xf32> to vector<4x8xf32>
    %113 = vector.shape_cast %112 : vector<4x8xf32> to vector<4x8x1xf32>
    %114 = tpu.reciprocal %113 {approx = true} : vector<4x8x1xf32> -> vector<4x8x1xf32>
    %115 = vector.broadcast %114 : vector<4x8x1xf32> to vector<4x8x8xf32>
    %116 = arith.mulf %111, %115 : vector<4x8x8xf32>
    %117 = arith.truncf %97 : vector<4x8x8xf32> to vector<4x8x8xbf16>
    %118 = arith.truncf %116 : vector<4x8x8xf32> to vector<4x8x8xbf16>
    "tpu.trace_start"() <{level = 10 : i32, message = "hdk,hqk->hdq"}> : () -> ()
    %cst_47 = arith.constant dense<0.000000e+00> : vector<4x8x8xf32>
    %119 = tpu.matmul %117, %118, %cst_47 {dimension_numbers = #tpu.dot_dimension_numbers<[2], [2], [1], [1], [0, 0, 0, 1, 1, 1], [0], [0]>} : vector<4x8x8xbf16>, vector<4x8x8xbf16>, vector<4x8x8xf32> -> vector<4x8x8xf32>
    "tpu.trace_stop"() : () -> ()
    %120 = vector.shape_cast %119 : vector<4x8x8xf32> to vector<32x8xf32>
    %c0_48 = arith.constant 0 : index
    %c0_49 = arith.constant 0 : index
    %c0_50 = arith.constant 0 : index
    %121 = vector.load %arg13[%c0_48, %c0_49, %c0_50] : memref<1x32x32xbf16, #tpu.memory_space<vmem>>, vector<1x32x32xbf16>
    %122 = vector.shape_cast %121 : vector<1x32x32xbf16> to vector<32x32xbf16>
    %123 = arith.truncf %120 : vector<32x8xf32> to vector<32x8xbf16>
    %cst_51 = arith.constant dense<0.000000e+00> : vector<32x8xf32>
    %124 = tpu.matmul %122, %123, %cst_51 {dimension_numbers = #tpu.dot_dimension_numbers<[1], [0], [0], [1], [0, 0, 1, 1], [], []>} : vector<32x32xbf16>, vector<32x8xbf16>, vector<32x8xf32> -> vector<32x8xf32>
    %125 = vector.extract_strided_slice %5 {offsets = [0, 4], sizes = [32, 1], strides = [1, 1]} : vector<32x10xf32> to vector<32x1xf32>
    %126 = vector.broadcast %125 : vector<32x1xf32> to vector<32x8xf32>
    %127 = arith.addf %124, %126 : vector<32x8xf32>
    %128 = arith.addf %76, %127 : vector<32x8xf32>
    %129 = vector.extract_strided_slice %5 {offsets = [0, 5], sizes = [32, 1], strides = [1, 1]} : vector<32x10xf32> to vector<32x1xf32>
    %130 = vector.extract_strided_slice %5 {offsets = [0, 6], sizes = [32, 1], strides = [1, 1]} : vector<32x10xf32> to vector<32x1xf32>
    %cst_52 = arith.constant dense<0.000000e+00> : vector<8xf32>
    %131 = vector.multi_reduction <add>, %128, %cst_52 [0] : vector<32x8xf32> to vector<8xf32>
    %132 = vector.shape_cast %131 : vector<8xf32> to vector<1x8xf32>
    %cst_53 = arith.constant 3.200000e+01 : f32
    %133 = vector.broadcast %cst_53 : f32 to vector<1x8xf32>
    %134 = arith.divf %132, %133 : vector<1x8xf32>
    %135 = vector.broadcast %134 : vector<1x8xf32> to vector<32x8xf32>
    %136 = arith.subf %128, %135 : vector<32x8xf32>
    %137 = arith.mulf %136, %136 : vector<32x8xf32>
    %cst_54 = arith.constant dense<0.000000e+00> : vector<8xf32>
    %138 = vector.multi_reduction <add>, %137, %cst_54 [0] : vector<32x8xf32> to vector<8xf32>
    %139 = vector.shape_cast %138 : vector<8xf32> to vector<1x8xf32>
    %cst_55 = arith.constant 3.200000e+01 : f32
    %140 = vector.broadcast %cst_55 : f32 to vector<1x8xf32>
    %141 = arith.divf %139, %140 : vector<1x8xf32>
    %142 = vector.broadcast %134 : vector<1x8xf32> to vector<32x8xf32>
    %143 = arith.subf %128, %142 : vector<32x8xf32>
    %cst_56 = arith.constant 9.99999974E-6 : f32
    %144 = vector.broadcast %cst_56 : f32 to vector<1x8xf32>
    %145 = arith.addf %141, %144 : vector<1x8xf32>
    %146 = math.rsqrt %145 : vector<1x8xf32>
    %147 = vector.broadcast %146 : vector<1x8xf32> to vector<32x8xf32>
    %148 = arith.mulf %143, %147 : vector<32x8xf32>
    %149 = vector.broadcast %129 : vector<32x1xf32> to vector<32x8xf32>
    %150 = arith.mulf %148, %149 : vector<32x8xf32>
    %151 = vector.broadcast %130 : vector<32x1xf32> to vector<32x8xf32>
    %152 = arith.addf %150, %151 : vector<32x8xf32>
    %c0_57 = arith.constant 0 : index
    %c0_58 = arith.constant 0 : index
    %c0_59 = arith.constant 0 : index
    %153 = vector.load %arg14[%c0_57, %c0_58, %c0_59] : memref<1x64x32xbf16, #tpu.memory_space<vmem>>, vector<1x64x32xbf16>
    %154 = vector.shape_cast %153 : vector<1x64x32xbf16> to vector<64x32xbf16>
    %155 = arith.truncf %152 : vector<32x8xf32> to vector<32x8xbf16>
    %cst_60 = arith.constant dense<0.000000e+00> : vector<64x8xf32>
    %156 = tpu.matmul %154, %155, %cst_60 {dimension_numbers = #tpu.dot_dimension_numbers<[1], [0], [0], [1], [0, 0, 1, 1], [], []>} : vector<64x32xbf16>, vector<32x8xbf16>, vector<64x8xf32> -> vector<64x8xf32>
    %c0_61 = arith.constant 0 : index
    %c0_62 = arith.constant 0 : index
    %c0_63 = arith.constant 0 : index
    %157 = vector.load %arg15[%c0_61, %c0_62, %c0_63] : memref<1x64x1xf32, #tpu.memory_space<vmem>>, vector<1x64x1xf32>
    %158 = vector.shape_cast %157 : vector<1x64x1xf32> to vector<64x1xf32>
    %159 = vector.broadcast %158 : vector<64x1xf32> to vector<64x8xf32>
    %160 = arith.addf %156, %159 : vector<64x8xf32>
    %cst_64 = arith.constant 0.000000e+00 : f32
    %161 = vector.broadcast %cst_64 : f32 to vector<64x8xf32>
    %162 = arith.maximumf %160, %161 : vector<64x8xf32>
    %c0_65 = arith.constant 0 : index
    %c0_66 = arith.constant 0 : index
    %c0_67 = arith.constant 0 : index
    %163 = vector.load %arg16[%c0_65, %c0_66, %c0_67] : memref<1x32x64xbf16, #tpu.memory_space<vmem>>, vector<1x32x64xbf16>
    %164 = vector.shape_cast %163 : vector<1x32x64xbf16> to vector<32x64xbf16>
    %165 = arith.truncf %162 : vector<64x8xf32> to vector<64x8xbf16>
    %cst_68 = arith.constant dense<0.000000e+00> : vector<32x8xf32>
    %166 = tpu.matmul %164, %165, %cst_68 {dimension_numbers = #tpu.dot_dimension_numbers<[1], [0], [0], [1], [0, 0, 1, 1], [], []>} : vector<32x64xbf16>, vector<64x8xbf16>, vector<32x8xf32> -> vector<32x8xf32>
    %167 = vector.extract_strided_slice %5 {offsets = [0, 7], sizes = [32, 1], strides = [1, 1]} : vector<32x10xf32> to vector<32x1xf32>
    %168 = vector.broadcast %167 : vector<32x1xf32> to vector<32x8xf32>
    %169 = arith.addf %166, %168 : vector<32x8xf32>
    %170 = arith.addf %152, %169 : vector<32x8xf32>
    %171 = vector.extract_strided_slice %5 {offsets = [0, 8], sizes = [32, 1], strides = [1, 1]} : vector<32x10xf32> to vector<32x1xf32>
    %172 = vector.extract_strided_slice %5 {offsets = [0, 9], sizes = [32, 1], strides = [1, 1]} : vector<32x10xf32> to vector<32x1xf32>
    %cst_69 = arith.constant dense<0.000000e+00> : vector<8xf32>
    %173 = vector.multi_reduction <add>, %170, %cst_69 [0] : vector<32x8xf32> to vector<8xf32>
    %174 = vector.shape_cast %173 : vector<8xf32> to vector<1x8xf32>
    %cst_70 = arith.constant 3.200000e+01 : f32
    %175 = vector.broadcast %cst_70 : f32 to vector<1x8xf32>
    %176 = arith.divf %174, %175 : vector<1x8xf32>
    %177 = vector.broadcast %176 : vector<1x8xf32> to vector<32x8xf32>
    %178 = arith.subf %170, %177 : vector<32x8xf32>
    %179 = arith.mulf %178, %178 : vector<32x8xf32>
    %cst_71 = arith.constant dense<0.000000e+00> : vector<8xf32>
    %180 = vector.multi_reduction <add>, %179, %cst_71 [0] : vector<32x8xf32> to vector<8xf32>
    %181 = vector.shape_cast %180 : vector<8xf32> to vector<1x8xf32>
    %cst_72 = arith.constant 3.200000e+01 : f32
    %182 = vector.broadcast %cst_72 : f32 to vector<1x8xf32>
    %183 = arith.divf %181, %182 : vector<1x8xf32>
    %184 = vector.broadcast %176 : vector<1x8xf32> to vector<32x8xf32>
    %185 = arith.subf %170, %184 : vector<32x8xf32>
    %cst_73 = arith.constant 9.99999974E-6 : f32
    %186 = vector.broadcast %cst_73 : f32 to vector<1x8xf32>
    %187 = arith.addf %183, %186 : vector<1x8xf32>
    %188 = math.rsqrt %187 : vector<1x8xf32>
    %189 = vector.broadcast %188 : vector<1x8xf32> to vector<32x8xf32>
    %190 = arith.mulf %185, %189 : vector<32x8xf32>
    %191 = vector.broadcast %171 : vector<32x1xf32> to vector<32x8xf32>
    %192 = arith.mulf %190, %191 : vector<32x8xf32>
    %193 = vector.broadcast %172 : vector<32x1xf32> to vector<32x8xf32>
    %194 = arith.addf %192, %193 : vector<32x8xf32>
    %c0_74 = arith.constant 0 : index
    %c0_75 = arith.constant 0 : index
    %195 = vector.load %arg19[%c0_74, %c0_75] : memref<32x8xf32, #tpu.memory_space<vmem>>, vector<32x8xf32>
    tpu.vector_store %arg19[%c0_74, %c0_75], %194 {strides = array<i32>} : memref<32x8xf32, #tpu.memory_space<vmem>>, vector<32x8xf32>,
    %c1_i32 = arith.constant 1 : i32
    %196 = arith.cmpi eq, %arg1, %c1_i32 : i32
    %197 = arith.extui %196 : i1 to i32
    %c0_i32_76 = arith.constant 0 : i32
    %198 = arith.cmpi ne, %197, %c0_i32_76 : i32
    scf.if %198 {
      %199 = tpu.transpose %194, [1, 0] : vector<32x8xf32> -> vector<8x32xf32>
      %c0_77 = arith.constant 0 : index
      %c0_78 = arith.constant 0 : index
      %c0_79 = arith.constant 0 : index
      %200 = vector.load %arg18[%c0_77, %c0_78, %c0_79] : memref<1x8x32xf32, #tpu.memory_space<vmem>>, vector<1x8x32xf32>
      %201 = vector.shape_cast %200 : vector<1x8x32xf32> to vector<8x32xf32>
      %202 = vector.shape_cast %199 : vector<8x32xf32> to vector<1x8x32xf32>
      tpu.vector_store %arg18[%c0_77, %c0_78, %c0_79], %202 {strides = array<i32>} : memref<1x8x32xf32, #tpu.memory_space<vmem>>, vector<1x8x32xf32>,
    } else {
    }
    return
  }
  func.func @transform_0(%arg0: i32, %arg1: i32) -> (i32, i32, i32) {
    %c0_i32 = arith.constant 0 : i32
    %c0_i32_0 = arith.constant 0 : i32
    %c0_i32_1 = arith.constant 0 : i32
    return %arg0, %c0_i32, %c0_i32_0 : i32, i32, i32
  }
  func.func @transform_1(%arg0: i32, %arg1: i32) -> (i32, i32, i32) {
    %c0_i32 = arith.constant 0 : i32
    %c0_i32_0 = arith.constant 0 : i32
    %c0_i32_1 = arith.constant 0 : i32
    return %arg0, %c0_i32, %c0_i32_0 : i32, i32, i32
  }
  func.func @transform_2(%arg0: i32, %arg1: i32) -> (i32, i32) {
    %c0_i32 = arith.constant 0 : i32
    %c0_i32_0 = arith.constant 0 : i32
    %c0_i32_1 = arith.constant 0 : i32
    return %c0_i32, %c0_i32_0 : i32, i32
  }
  func.func @transform_3(%arg0: i32, %arg1: i32) -> (i32, i32) {
    %c0_i32 = arith.constant 0 : i32
    %c0_i32_0 = arith.constant 0 : i32
    %c0_i32_1 = arith.constant 0 : i32
    return %c0_i32, %c0_i32_0 : i32, i32
  }
  func.func @transform_4(%arg0: i32, %arg1: i32) -> (i32, i32) {
    %c0_i32 = arith.constant 0 : i32
    %c0_i32_0 = arith.constant 0 : i32
    %c0_i32_1 = arith.constant 0 : i32
    return %c0_i32, %c0_i32_0 : i32, i32
  }
  func.func @transform_5(%arg0: i32, %arg1: i32) -> (i32, i32, i32) {
    %c0_i32 = arith.constant 0 : i32
    %c0_i32_0 = arith.constant 0 : i32
    %c0_i32_1 = arith.constant 0 : i32
    return %arg1, %c0_i32, %c0_i32_0 : i32, i32, i32
  }
  func.func @transform_6(%arg0: i32, %arg1: i32) -> (i32, i32, i32) {
    %c0_i32 = arith.constant 0 : i32
    %c0_i32_0 = arith.constant 0 : i32
    %c0_i32_1 = arith.constant 0 : i32
    return %arg1, %c0_i32, %c0_i32_0 : i32, i32, i32
  }
  func.func @transform_7(%arg0: i32, %arg1: i32) -> (i32, i32, i32) {
    %c0_i32 = arith.constant 0 : i32
    %c0_i32_0 = arith.constant 0 : i32
    %c0_i32_1 = arith.constant 0 : i32
    return %arg1, %c0_i32, %c0_i32_0 : i32, i32, i32
  }
  func.func @transform_8(%arg0: i32, %arg1: i32) -> (i32, i32, i32) {
    %c0_i32 = arith.constant 0 : i32
    %c0_i32_0 = arith.constant 0 : i32
    %c0_i32_1 = arith.constant 0 : i32
    return %arg1, %c0_i32, %c0_i32_0 : i32, i32, i32
  }
  func.func @transform_9(%arg0: i32, %arg1: i32) -> (i32, i32, i32) {
    %c0_i32 = arith.constant 0 : i32
    %c0_i32_0 = arith.constant 0 : i32
    %c0_i32_1 = arith.constant 0 : i32
    return %arg1, %c0_i32, %c0_i32_0 : i32, i32, i32
  }
  func.func @transform_10(%arg0: i32, %arg1: i32) -> (i32, i32, i32) {
    %c0_i32 = arith.constant 0 : i32
    %c0_i32_0 = arith.constant 0 : i32
    %c0_i32_1 = arith.constant 0 : i32
    return %arg1, %c0_i32, %c0_i32_0 : i32, i32, i32
  }
  func.func @transform_11(%arg0: i32, %arg1: i32) -> (i32, i32, i32) {
    %c0_i32 = arith.constant 0 : i32
    %c0_i32_0 = arith.constant 0 : i32
    %c0_i32_1 = arith.constant 0 : i32
    return %arg1, %c0_i32, %c0_i32_0 : i32, i32, i32
  }
  func.func @transform_12(%arg0: i32, %arg1: i32) -> (i32, i32, i32) {
    %c0_i32 = arith.constant 0 : i32
    %c0_i32_0 = arith.constant 0 : i32
    %c0_i32_1 = arith.constant 0 : i32
    return %arg1, %c0_i32, %c0_i32_0 : i32, i32, i32
  }
  func.func @transform_13(%arg0: i32, %arg1: i32) -> (i32, i32, i32) {
    %c0_i32 = arith.constant 0 : i32
    %c0_i32_0 = arith.constant 0 : i32
    %c0_i32_1 = arith.constant 0 : i32
    return %arg1, %c0_i32, %c0_i32_0 : i32, i32, i32
  }
  func.func @transform_14(%arg0: i32, %arg1: i32) -> (i32, i32, i32) {
    %c0_i32 = arith.constant 0 : i32
    %c0_i32_0 = arith.constant 0 : i32
    %c0_i32_1 = arith.constant 0 : i32
    return %arg1, %c0_i32, %c0_i32_0 : i32, i32, i32
  }
  func.func @transform_15(%arg0: i32, %arg1: i32) -> (i32, i32, i32) {
    %c0_i32 = arith.constant 0 : i32
    %c0_i32_0 = arith.constant 0 : i32
    %c0_i32_1 = arith.constant 0 : i32
    return %arg1, %c0_i32, %c0_i32_0 : i32, i32, i32
  }
  func.func @transform_16(%arg0: i32, %arg1: i32) -> (i32, i32, i32) {
    %c0_i32 = arith.constant 0 : i32
    %c0_i32_0 = arith.constant 0 : i32
    %c0_i32_1 = arith.constant 0 : i32
    return %arg0, %c0_i32, %c0_i32_0 : i32, i32, i32
  }
}

</mosaic_0001>

<bundles_post_ra>
// kernel: tpu_custom_call.1
= control target key start
LH: loop header
LB: loop body
LE: loop exit
PB: predicated region body
PF: predicated region fallthrough
CT: control target
= control target key end

     0   :  { %s4638_s0 = inlined_call_operand.vmem [shape: f32[2,8,32], index: 0, kind: input, shape index: {}]   ;;  %s4639_s1 = inlined_call_operand.vmem [shape: bf16[2,32,8], index: 1, kind: input, shape index: {}]   ;;  %s4640_s2 = inlined_call_operand.vmem [shape: f32[8,32], index: 2, kind: input, shape index: {}]   ;;  %s4641_s3 = inlined_call_operand.vmem [shape: f32[8,8], index: 3, kind: input, shape index: {}]   ;;  %s4642_s4 = inlined_call_operand.vmem [shape: f32[8,8], index: 4, kind: input, shape index: {}]   ;;  %s4643_s5 = inlined_call_operand.vmem [shape: bf16[2,96,32], index: 5, kind: input, shape index: {}]   ;;  %s4644_s6 = inlined_call_operand.vmem [shape: f32[2,96,1], index: 6, kind: input, shape index: {}]   ;;  %s4645_s7 = inlined_call_operand.vmem [shape: bf16[2,32,32], index: 7, kind: input, shape index: {}]   ;;  %s4646_s8 = inlined_call_operand.vmem [shape: bf16[2,32,32], index: 8, kind: input, shape index: {}]   ;;  %s4647_s9 = inlined_call_operand.vmem [shape: bf16[2,64,32], index: 9, kind: input, shape index: {}]   ;;  %s4648_s10 = inlined_call_operand.vmem [shape: f32[2,64,1], index: 10, kind: input, shape index: {}]   ;;  %s4649_s11 = inlined_call_operand.vmem [shape: bf16[2,32,32], index: 11, kind: input, shape index: {}]   ;;  %s4650_s12 = inlined_call_operand.vmem [shape: bf16[2,64,32], index: 12, kind: input, shape index: {}]   ;;  %s4651_s13 = inlined_call_operand.vmem [shape: f32[2,64,1], index: 13, kind: input, shape index: {}]   ;;  %s4652_s14 = inlined_call_operand.vmem [shape: bf16[2,32,64], index: 14, kind: input, shape index: {}]   ;;  %s4653_s15 = inlined_call_operand.vmem [shape: f32[2,32,10], index: 15, kind: input, shape index: {}]   ;;  %s4654_s16 = inlined_call_operand.hbm [shape: f32[2,8,32], index: 16, kind: output, shape index: {}]  }
   0x1   :  { %4670 = sst [smem:[#allocation19_spill]] %s4638_s0 }
   0x2   :  { %4671 = sst [smem:[#allocation20_spill]] %s4639_s1 }
   0x3   :  { %4672 = sst [smem:[#allocation21_spill]] %s4640_s2 }
   0x4   :  { %4673 = sst [smem:[#allocation22_spill]] %s4641_s3 }
   0x5   :  { %4674 = sst [smem:[#allocation23_spill]] %s4642_s4 }
   0x6   :  { %4675 = sst [smem:[#allocation24_spill]] %s4643_s5 }
   0x7   :  { %4676 = sst [smem:[#allocation25_spill]] %s4644_s6 }
   0x8   :  { %4677 = sst [smem:[#allocation26_spill]] %s4645_s7 }
   0x9   :  { %4678 = sst [smem:[#allocation27_spill]] %s4646_s8 }
   0xa   :  { %4679 = sst [smem:[#allocation28_spill]] %s4647_s9 }
   0xb   :  { %4680 = sst [smem:[#allocation29_spill]] %s4648_s10 }
   0xc   :  { %4681 = sst [smem:[#allocation30_spill]] %s4649_s11 }
   0xd   :  { %4682 = sst [smem:[#allocation31_spill]] %s4653_s15 }
   0xe   :  { %4683 = sst [smem:[#allocation32_spill]] %s4654_s16 }
   0xf   :  { %21 = vsyncpa [#allocation4], 0 }
  0x10   :  { %23 = vsyncpa [#allocation4 + $0x1], 0  ;;  %s4116_s21 = smov 0   ;;  %s4118_s22 = smov 0  }
  0x11   :  { %s4120_s23 = smov 0   ;;  %s4122_s24 = smov 0  }
  0x12   :  { %s4124_s25 = smov 0   ;;  %s4126_s26 = smov 0  }
  0x13   :  { %s4128_s27 = smov 0   ;;  %s4130_s28 = smov 0  }
  0x14 LB: > { %4684 = sst [smem:[#allocation6_spill]] %s3988_s21  ;;  %s3385_s29 = sadd.s32 4294967295, %s4016_s28   ;;  %s4016_s28 = sphi %s4130_s28, %s29_s28   ;;  %s4012_s27 = sphi %s4128_s27, %s4728_s27   ;;  %s4008_s26 = sphi %s4126_s26, %s4727_s26   ;;  %s4004_s25 = sphi %s4124_s25, %s4726_s25   ;;  %s4000_s24 = sphi %s4122_s24, %s4725_s24   ;;  %s3996_s23 = sphi %s4120_s23, %s4724_s23   ;;  %s3992_s22 = sphi %s4118_s22, %s4723_s22   ;;  %s3988_s21 = sphi %s4116_s21, %s4722_s21  }
  0x15   : > { %4685 = sst [smem:[#allocation7_spill]] %s3992_s22  ;;  %s3386_s30 = sadd.s32 4294967294, %s4016_s28  }
  0x16   : > { %4686 = sst [smem:[#allocation8_spill]] %s3996_s23  ;;  %s38_s0 = sadd.s32 1, %s4008_s26 }
  0x17   : > { %4687 = sst [smem:[#allocation9_spill]] %s4000_s24  ;;  %p39_p0 = scmp.ge.s32.totalorder %s38_s0, 2 }
  0x18   : > { %4688 = sst [smem:[#allocation10_spill]] %s4004_s25  ;;  %s41_s17 = sadd.s32 1, %s4012_s27 }
  0x19   : > { %4689 = sst [smem:[#allocation11_spill]] %s4008_s26  ;;  %p459_p1 = scmp.ne.s32.totalorder %s3996_s23, %s3992_s22 }
  0x1a   : > { %4690 = sst [smem:[#allocation12_spill]] %s4012_s27  ;;  %p460_p2 = scmp.eq.s32.totalorder %s3385_s29, 3 }
  0x1b   : > { %4691 = sst [smem:[#allocation13_spill]] %s4016_s28  ;;  %s4730_s0 = smov (%p39_p0, %s38_s0), 0 }
  0x1c   : > { %4692 = sst [smem:[#allocation14_spill]] %s4730_s0  ;;  %s4732_s17 = smov (!%p39_p0, %s41_s17), %s4012_s27 }
  0x1d   : > { %p4165_p3 = por %p460_p2, %p459_p1  ;;  %p465_p4 = scmp.ne.s32.totalorder %s3992_s22, %s3988_s21 }
  0x1e   : > { %p43_p5 = scmp.ge.s32.totalorder %s4732_s17, 2  ;;  %p466_p6 = scmp.eq.s32.totalorder %s3386_s30, 3 }
  0x1f   : > { %s4693_s18 = scalar_select %p4165_p3, 1, 0 }
  0x20   : > { %p3389_p7 = scmp.ge.s32.totalorder %s4016_s28, 1  ;;  %p596_p8 = scmp.lt.s32.totalorder %s4016_s28, 5 }
  0x21   : > { %4694 = sst [smem:[#allocation15_spill]] %s4693_s18  ;;  %s4734_s17 = smov (%p43_p5, %s4732_s17), 0 }
  0x22   : > { %4695 = sst [smem:[#allocation16_spill]] %s4734_s17  ;;  %p4175_p9 = por %p466_p6, %p465_p4 }
  0x23   : > { %p597_p10 = pnand %p3389_p7, %p596_p8  ;;  %s446_s20 = ssub.s32 %s4012_s27, %s4734_s17 }
  0x24   : > { %s4696_s19 = scalar_select %p4175_p9, 1, 0 }
  0x25   : > { %s449_s29 = sadd.s32 1, %s3996_s23  ;;  %p447_p11 = scmp.eq.s32.totalorder %s446_s20, 0 }
  0x26   : > { %4697 = sst [smem:[#allocation17_spill]] %s4696_s19  ;;  %600 = sbr.rel (%p597_p10) target bundleno = 3746 (0xea2), region = 84 }
  0x27   : > { %s4183_s0 = scalar_select %p447_p11, %s3996_s23, %s449_s29  }
  0x28   : > { %s4667_s30 = sand.u32 (!%p597_p10), 1, %s3992_s22   ;;  %p705_p12 = scmp.lt.s32.totalorder (!%p597_p10), %s4004_s25, 1 }
  0x29   : > { %4698 = sst [smem:[#allocation18_spill]] %s4183_s0  ;;  %s4189_s26 = sshll.u32 (!%p597_p10), %s4667_s30, 3 }
  0x2a   : > { %p714_p13 = scmp.lt.s32.totalorder (!%p597_p10), %s4000_s24, 1  ;;  %s4699_s0 = sld [smem:[#allocation19_spill]] (!%p597_p10) }
  0x2b   : > { %s4700_s1 = sld [smem:[#allocation20_spill]] (!%p597_p10)  ;;  %s4701_s7 = sld [smem:[#allocation26_spill]] (!%p597_p10) }
  0x2c   : > { %s4702_s5 = sld [smem:[#allocation24_spill]] (!%p597_p10)  ;;  %s4703_s8 = sld [smem:[#allocation27_spill]] (!%p597_p10) }
  0x2d   : > { %s706_s19 = scalar_select %p705_p12, %s4004_s25, 1 }
  0x2e   : > { %s715_s21 = scalar_select %p714_p13, %s4000_s24, 1 }
  0x2f   : > { %s3391_s17 = sshll.u32 %s706_s19, 3  ;;  %s3482_s27 = sshll.u32 %s706_s19, 4 }
  0x30   : > { %s708_s23 = scalar_lea.vmem %s4699_s0, %s3391_s17  ;;  %s3734_s4 = smul.u32 48, %s715_s21 }
  0x31   : > { %s4200_s18 = scalar_lea.vmem %s4700_s1, %s3482_s27  ;;  %s3483_s3 = sshll.u32 %s715_s21, 4 }
  0x32   : > { %s3735_s22 = smul.u32 96, %s715_s21  ;;  %s4205_s25 = scalar_lea.vmem %s4701_s7, %s3483_s3 }
  0x33   : > { %s4210_s15 = scalar_lea.vmem %s4702_s5, %s3734_s4  ;;  %s4215_s16 = scalar_lea.vmem %s4703_s8, %s3483_s3 }
  0x34   : > { %s4704_s6 = sld [smem:[#allocation25_spill]]  ;;  %s3485_s29 = sshll.u32 %s715_s21, 5 }
  0x35   : > { %s4705_s9 = sld [smem:[#allocation28_spill]]  ;;  %s3486_s7 = sshll.u32 %s715_s21, 6 }
  0x36   : > { %s4706_s10 = sld [smem:[#allocation29_spill]]  ;;  %s4707_s11 = sld [smem:[#allocation30_spill]] }
  0x37   : > { %s4240_s28 = scalar_lea.vmem %s4650_s12, %s3485_s29  ;;  %s4245_s2 = scalar_lea.vmem %s4651_s13, %s3486_s7 }
  0x38   : > { %s4250_s24 = scalar_lea.vmem %s4652_s14, %s3483_s3  ;;  %s4708_s0 = sld [smem:[#allocation31_spill]] }
  0x3a   : > { %s4220_s20 = scalar_lea.vmem %s4704_s6, %s3735_s22 }
  0x3b   : > { %s4225_s30 = scalar_lea.vmem %s4705_s9, %s3485_s29 }
  0x3c   : > { %s4230_s19 = scalar_lea.vmem %s4706_s10, %s3486_s7  ;;  %s4235_s5 = scalar_lea.vmem %s4707_s11, %s3483_s3 }
  0x3d   : > { %s704_s10 = scalar_lea.vmem [#allocation3], %s4189_s26  ;;  %s4709_s11 = sld [smem:[#allocation9_spill]] }
  0x3e   : > { %s4255_s17 = scalar_lea.vmem %s4708_s0, %s3485_s29 }
  0x43   : > { %p3414_p0 = scmp.ne.s32.totalorder %s4709_s11, 0 }
  0x44   : > { %v774_v0 = vld [vmem:[%s708_s23] sm:$0xff] (!%p3414_p0)  ;;  %s4710_s6 = sld [smem:[#allocation21_spill]] (!%p3414_p0)  ;;  %vm809_vm0 = vcmask (!%p3414_p0), 64512  }
  0x45   : > { %773 = sbr.rel (%p3414_p0) target bundleno = 219 (0xdb), region = 88 }
  0x4a   : > { %v775_v1 = vld [vmem:[%s4710_s6] sm:$0xff] (!%p3414_p0) }
  0x4b   : > { %v776_v2 = vadd.f32 (!%p3414_p0), %v775_v1, %v774_v0 }
  0x4d   : > { %777 = vxpose.xlu0.b32.start.end [1/1] (short) (narrow) %v776_v2, 32 }
  0xcd   : > { %v793_v3 = vpop.trf.xlu0 }
  0xce   : > { %810 = vst.msk [vmem:[#allocation2] sm:$0xff] %vm809_vm0, %v793_v3 }
  0xd1   : > { %v794_v4 = vpop.trf.xlu0 }
  0xd2   : > { %811 = vst.msk [vmem:[#allocation2 + $0x8] sm:$0xff] %vm809_vm0, %v794_v4 }
  0xd5   : > { %v795_v5 = vpop.trf.xlu0 }
  0xd6   : > { %812 = vst.msk [vmem:[#allocation2 + $0x10] sm:$0xff] %vm809_vm0, %v795_v5 }
  0xd9   : > { %v796_v6 = vpop.trf.xlu0 }
  0xda   : > { %813 = vst.msk [vmem:[#allocation2 + $0x18] sm:$0xff] %vm809_vm0, %v796_v6 }
  0xdb PF: > { %v4262_v7 = vld [vmem:[#allocation2] sm:$0xff]  ;;  %v4264_v8 = vld [vmem:[#allocation2 + $0x8] sm:$0xff]  ;;  %vm940_vm1 = vcmask 261120   ;;  %v4018_v12 = vmov 0   ;;  %v840_v17 = vld [vmem:[%s4220_s20 + $0x10] sm:$0xff]  ;;  %v4019_v26 = vmov 0.0  }
  0xdc   : > { %v836_v10 = vpack.c.bf16 %v4264_v8, %v4262_v7  ;;  %3821 = vset.pattern.permute.xlu0 %v4018_v12  ;;  %3822 = vset.pattern.permute.xlu1 %v4018_v12  ;;  %v3856_v14 = vld [vmem:[%s4210_s15] sm:$0xff]   ;;  %v3857_v16 = vld [vmem:[%s4210_s15 + $0x8] sm:$0xff]   ;;  %v3858_v18 = vld [vmem:[%s4210_s15 + $0x10] sm:$0xff]   ;;  %vm4020_vm2 = vmmov 0   ;;  %vm1180_vm3 = vcmask 1043456   ;;  %vm1176_vm4 = vcmask 64512  }
  0xdd   : > { %v4266_v9 = vld [vmem:[#allocation2 + $0x10] sm:$0xff]  ;;  %3566 = vmatprep.mubr.msk.bf16.mxu0 %vm940_vm1, %v3856_v14  ;;  %v838_v15 = vld [vmem:[%s4220_s20] sm:$0xff]  ;;  %v839_v19 = vld [vmem:[%s4220_s20 + $0x8] sm:$0xff]  ;;  %862 = vperm.xlu1 %3822, %v840_v17   ;;  %s4711_s8 = sld [smem:[#allocation22_spill]]  ;;  %vm2974_vm5 = vcmask 523264  }
  0xde   : > { %3562 = vmatprep.subr.bf16.mxu0 %v836_v10  ;;  %852 = vperm.xlu0 %3821, %v838_v15   ;;  %v841_v20 = vld [vmem:[%s4220_s20 + $0x18] sm:$0xff]  ;;  %v842_v21 = vld [vmem:[%s4220_s20 + $0x20] sm:$0xff]  ;;  %v843_v22 = vld [vmem:[%s4220_s20 + $0x28] sm:$0xff] }
  0xdf   : > { %3563 = vmatpush3.bf16.msra.mxu0 %v836_v10  ;;  %v3859_v23 = vld [vmem:[%s4210_s15 + $0x18] sm:$0xff]   ;;  %v844_v24 = vld [vmem:[%s4220_s20 + $0x30] sm:$0xff]  ;;  %3578 = vmatprep.subr.bf16.mxu1 %v4019_v26  ;;  %v3860_v47 = vld [vmem:[%s4210_s15 + $0x20] sm:$0xff]  }
  0xe0   : > { %v845_v25 = vld [vmem:[%s4220_s20 + $0x38] sm:$0xff]  ;;  %3580 = vmatprep.mubr.msk.bf16.mxu1 %vm4020_vm2, %v4019_v26  ;;  %v3861_v48 = vld [vmem:[%s4210_s15 + $0x28] sm:$0xff]   ;;  %s4712_s15 = sld [smem:[#allocation23_spill]] }
  0xe1   : > { %v4270_v11 = vld [vmem:[#allocation2 + $0x18] sm:$0xff]  ;;  %867 = vperm.xlu1 %3822, %v841_v20  }
  0xe2   : > { %v837_v13 = vpack.c.bf16 %v4270_v11, %v4266_v9  ;;  %857 = vperm.xlu0 %3821, %v839_v19  }
  0xe3   : > { %v822_v6 = vld [vmem:[%s4711_s8] sm:$0xff] }
  0xe4   : > { %3564 = vmatprep.subr.bf16.mxu0 %v837_v13 }
  0xe5   : > { %3565 = vmatpush3.bf16.msra.mxu0 %v837_v13  ;;  %877 = vperm.xlu1 %3822, %v843_v22  }
  0xe6   : > { %872 = vperm.xlu0 %3821, %v842_v21   ;;  %3602 = vmatprep.subr.bf16.mxu0 %v4019_v26 }
  0xe8   : > { %3567 = vmatmul.mubr.msk.bf16.vlgmr.msra.gmra.mrb[0].mxu0 %vm940_vm1, %v3857_v16 }
  0xe9   : > { %3570 = vmatprep.mubr.msk.bf16.mxu0 %vm940_vm1, %v3858_v18  ;;  %887 = vperm.xlu1 %3822, %v845_v25  }
  0xea   : > { %882 = vperm.xlu0 %3821, %v844_v24  }
  0xf0   : > { %3571 = vmatmul.mubr.msk.bf16.gmra.mrb[4].mxu0 %vm940_vm1, %v3859_v23 }
  0xf1   : > { %3574 = vmatprep.mubr.msk.bf16.mxu0 %vm940_vm1, %v3860_v47 }
  0xf8   : > { %3575 = vmatmul.mubr.msk.bf16.gmra.mrb[8].mxu0 %vm940_vm1, %v3861_v48 }
  0xf9   : > { %3604 = vmatprep.mubr.msk.bf16.mxu0 %vm4020_vm2, %v4019_v26 }
 0x15c   : > { %v863_v29 = vpop.permute.xlu1 %862 }
 0x15d   : > { %v853_v27 = vpop.permute.xlu0 %852 }
 0x160   : > { %v868_v37 = vpop.permute.xlu1 %867 }
 0x161   : > { %v858_v33 = vpop.permute.xlu0 %857 }
 0x164   : > { %v878_v49 = vpop.permute.xlu1 %877 }
 0x165   : > { %v873_v39 = vpop.permute.xlu0 %872 }
 0x168   : > { %v888_v53 = vpop.permute.xlu1 %887 }
 0x169   : > { %v883_v51 = vpop.permute.xlu0 %882 }
 0x1bb   : > { %v3568_v28 = vpop.f32.mrb[0].mxu0 }
 0x1bc   : > { %v993_v30 = vpop.f32.mrb[1].mxu0  ;;  %v1002_v36 = vadd.f32 %v3568_v28, %v863_v29 }
 0x1bd   : > { %v994_v31 = vadd.f32 %v993_v30, %v853_v27  ;;  %v3569_v32 = vpop.f32.mrb[2].mxu0 }
 0x1be   : > { %v996_v34 = vpop.f32.mrb[3].mxu0  ;;  %v1005_v41 = vadd.f32 %v3569_v32, %v868_v37 }
 0x1bf   : > { %v997_v35 = vadd.f32 %v996_v34, %v858_v33  ;;  %1040 = vxpose.xlu0.b32.start.end [1/1] (short) (narrow) %v994_v31, 8 }
 0x1c1   : > { %1072 = vxpose.xlu1.b32.start.end [1/1] (short) (narrow) %v997_v35, 8 }
 0x1c3   : > { %v3572_v38 = vpop.f32.mrb[4].mxu0  ;;  %1104 = vxpose.xlu0.b32.start.end [1/1] (short) (narrow) %v1002_v36, 8 }
 0x1c4   : > { %v1009_v40 = vpop.f32.mrb[5].mxu0  ;;  %v1018_v56 = vadd.f32 %v3572_v38, %v883_v51 }
 0x1c5   : > { %v1010_v42 = vadd.f32 %v1009_v40, %v873_v39  ;;  %v3573_v43 = vpop.f32.mrb[6].mxu0  ;;  %v846_v40 = vld [vmem:[%s4220_s20 + $0x40] sm:$0xff] }
 0x1c6   : > { %v1012_v44 = vpop.f32.mrb[7].mxu0  ;;  %v1174_v59 = vpack.c.bf16 %v1018_v56, %v1018_v56  ;;  %v1021_v62 = vadd.f32 %v3573_v43, %v888_v53 }
 0x1c7   : > { %v1172_v45 = vpack.c.bf16 %v1010_v42, %v1010_v42  ;;  %1136 = vxpose.xlu0.b32.start.end [1/1] (short) (narrow) %v1005_v41, 8  ;;  %v1013_v50 = vadd.f32 %v1012_v44, %v878_v49 }
 0x1c8   : > { %v1274_v61 = vsel %vm1180_vm3, %v1174_v59, 0  ;;  %v1175_v0 = vpack.c.bf16 %v1021_v62, %v1021_v62 }
 0x1c9   : > { %v1182_v46 = vsel %vm1180_vm3, %v1172_v45, 0  ;;  %v1173_v52 = vpack.c.bf16 %v1013_v50, %v1013_v50 }
 0x1ca   : > { %3579 = vmatpush3.bf16.msra.mxu1 %v1182_v46  ;;  %v1320_v2 = vsel %vm1180_vm3, %v1175_v0, 0  ;;  %v849_v0 = vld [vmem:[%s4220_s20 + $0x58] sm:$0xff] }
 0x1cb   : > { %3584 = vmatprep.subr.bf16.mxu1 %v4019_v26  ;;  %v1228_v57 = vsel %vm1180_vm3, %v1173_v52, 0  ;;  %v4330_v41 = vpop.f32.mrb[8].mxu0 }
 0x1cc   : > { %v1025_v42 = vpop.f32.mrb[9].mxu0 }
 0x23f   : > { %v1056_v54 = vpop.trf.xlu0 }
 0x240   : > { %v1168_v55 = vpack.c.bf16 %v1056_v54, %v1056_v54 }
 0x241   : > { %v1088_v58 = vpop.trf.xlu1 }
 0x242   : > { %3581 = vmatmul.mubr.msk.bf16.vlgmr.msra.gmra.mrb[0].mxu1 %vm1176_vm4, %v1168_v55  ;;  %v1169_v60 = vpack.c.bf16 %v1088_v58, %v1088_v58 }
 0x243   : > { %3585 = vmatpush3.bf16.msra.mxu1 %v1228_v57  ;;  %3586 = vmatprep.mubr.msk.bf16.mxu1 %vm4020_vm2, %v4019_v26  ;;  %v1120_v63 = vpop.trf.xlu0 }
 0x244   : > { %3590 = vmatprep.subr.bf16.mxu1 %v4019_v26  ;;  %v1170_v1 = vpack.c.bf16 %v1120_v63, %v1120_v63  ;;  %v848_v63 = vld [vmem:[%s4220_s20 + $0x50] sm:$0xff] }
 0x247   : > { %v1152_v3 = vpop.trf.xlu0 }
 0x248   : > { %v1171_v4 = vpack.c.bf16 %v1152_v3, %v1152_v3 }
 0x24a   : > { %3587 = vmatmul.mubr.msk.bf16.vlgmr.msra.gmra.mrb[4].mxu1 %vm1176_vm4, %v1169_v60 }
 0x24b   : > { %3591 = vmatpush3.bf16.msra.mxu1 %v1274_v61  ;;  %3592 = vmatprep.mubr.msk.bf16.mxu1 %vm4020_vm2, %v4019_v26 }
 0x24c   : > { %3596 = vmatprep.subr.bf16.mxu1 %v4019_v26 }
 0x252   : > { %3593 = vmatmul.mubr.msk.bf16.vlgmr.msra.gmra.mrb[8].mxu1 %vm1176_vm4, %v1170_v1  ;;  %v3577_v1 = vpop.f32.mrb[10].mxu0 }
 0x253   : > { %3597 = vmatpush3.bf16.msra.mxu1 %v1320_v2  ;;  %3598 = vmatprep.mubr.msk.bf16.mxu1 %vm4020_vm2, %v4019_v26  ;;  %v4339_v2 = vld [vmem:[%s4255_s17 + $0x8] sm:$0xff]  ;;  %v1028_v3 = vpop.f32.mrb[11].mxu0 }
 0x254   : > { %3608 = vmatprep.subr.bf16.mxu1 %v4019_v26 }
 0x25a   : > { %3599 = vmatmul.mubr.msk.bf16.vlgmr.msra.gmra.mrb[12].mxu1 %vm1176_vm4, %v1171_v4  ;;  %v4343_v4 = vld [vmem:[%s4255_s17 + $0x18] sm:$0xff] }
 0x25b   : > { %3610 = vmatprep.mubr.msk.bf16.mxu1 %vm4020_vm2, %v4019_v26 }
 0x315   : > { %v1218_v5 = vpop.f32.mrb[0].mxu1 }
 0x316   : > { %v1362_v10 = vmul.f32 0.35355338, %v1218_v5  ;;  %v3582_v13 = vpop.f32.mrb[1].mxu1  ;;  %v847_v5 = vld [vmem:[%s4220_s20 + $0x48] sm:$0xff] }
 0x317   : > { %v1221_v14 = vpop.f32.mrb[2].mxu1 }
 0x318   : > { %v3583_v15 = vpop.f32.mrb[3].mxu1  ;;  %v1366_v16 = vadd.f32 %v1362_v10, %v822_v6  ;;  %v4352_v10 = vld [vmem:[%s4255_s17 + $0x10] sm:$0xff] }
 0x31a   : > { %v1370_v17 = vsel %vm1176_vm4, %v1366_v16, -inf }
 0x31b   : > { %1371 = vmax.xlane.f32.xlu0 %v1370_v17 }
 0x31d   : > { %v1264_v18 = vpop.f32.mrb[4].mxu1 }
 0x31e   : > { %v1363_v19 = vmul.f32 0.35355338, %v1264_v18  ;;  %v3588_v20 = vpop.f32.mrb[5].mxu1 }
 0x31f   : > { %v1267_v21 = vpop.f32.mrb[6].mxu1 }
 0x320   : > { %v3589_v22 = vpop.f32.mrb[7].mxu1  ;;  %v1367_v23 = vadd.f32 %v1363_v19, %v822_v6 }
 0x322   : > { %v1373_v24 = vsel %vm1176_vm4, %v1367_v23, -inf }
 0x323   : > { %1374 = vmax.xlane.f32.xlu1 %v1373_v24 }
 0x325   : > { %v1310_v25 = vpop.f32.mrb[8].mxu1 }
 0x326   : > { %v1364_v27 = vmul.f32 0.35355338, %v1310_v25  ;;  %v3594_v28 = vpop.f32.mrb[9].mxu1 }
 0x327   : > { %v1313_v29 = vpop.f32.mrb[10].mxu1 }
 0x328   : > { %v3595_v30 = vpop.f32.mrb[11].mxu1  ;;  %v1368_v31 = vadd.f32 %v1364_v27, %v822_v6 }
 0x32a   : > { %v1376_v32 = vsel %vm1176_vm4, %v1368_v31, -inf }
 0x32b   : > { %1377 = vmax.xlane.f32.xlu1 %v1376_v32 }
 0x32d   : > { %v1356_v33 = vpop.f32.mrb[12].mxu1 }
 0x32e   : > { %v1365_v34 = vmul.f32 0.35355338, %v1356_v33  ;;  %v3600_v35 = vpop.f32.mrb[13].mxu1 }
 0x32f   : > { %v1359_v36 = vpop.f32.mrb[14].mxu1 }
 0x330   : > { %v3601_v37 = vpop.f32.mrb[15].mxu1  ;;  %v1369_v38 = vadd.f32 %v1365_v34, %v822_v6  ;;  %v4348_v6 = vld [vmem:[%s4255_s17] sm:$0xff] }
 0x332   : > { %v1379_v39 = vsel %vm1176_vm4, %v1369_v38, -inf }
 0x333   : > { %1380 = vmax.xlane.f32.xlu0 %v1379_v39 }
 0x33c   : > { %892 = vperm.xlu1 %3822, %v846_v40  }
 0x3a8   : > { %v1372_v43 = vpop.xlane.xlu0 %1371 }
 0x3a9   : > { %v1382_v44 = vsub.f32 %v1366_v16, %v1372_v43 }
 0x3ab   : > { %v1386_v45 = vmul.f32 1.442695, %v1382_v44 }
 0x3ad   : > { %3880 = vpow2.f32 %v1386_v45 }
 0x3b0   : > { %v1375_v46 = vpop.xlane.xlu1 %1374 }
 0x3b1   : > { %v1383_v47 = vsub.f32 %v1367_v23, %v1375_v46 }
 0x3b3   : > { %v1388_v48 = vmul.f32 1.442695, %v1383_v47  ;;  %v4021_v47 = vmov 1  }
 0x3b5   : > { %3882 = vpow2.f32 %v1388_v48  ;;  %v4022_v48 = vmov 2  }
 0x3b7   : > { %v3881_v49 = vpop.eup %3880 }
 0x3b8   : > { %v1378_v50 = vpop.xlane.xlu1 %1377  ;;  %v1394_v51 = vsel %vm1176_vm4, %v3881_v49, 0.0 }
 0x3b9   : > { %v1384_v52 = vsub.f32 %v1368_v31, %v1378_v50  ;;  %1395 = vadd.xlane.f32.xlu1 %v1394_v51 }
 0x3bb   : > { %v1390_v53 = vmul.f32 1.442695, %v1384_v52 }
 0x3bc   : > { %v893_v13 = vpop.permute.xlu1 %892 }
 0x3bd   : > { %3884 = vpow2.f32 %v1390_v53  ;;  %v1026_v21 = vadd.f32 %v1025_v42, %v893_v13  ;;  %v3864_v13 = vld [vmem:[%s4215_s16] sm:$0xff]  }
 0x3bf   : > { %v3883_v54 = vpop.eup %3882  ;;  %v1414_v24 = vpack.c.bf16 %v1026_v21, %v1026_v21  ;;  %v1885_v21 = vld [vmem:[%s4230_s19 + $0x10] sm:$0xff] }
 0x3c0   : > { %v1381_v55 = vpop.xlane.xlu0 %1380  ;;  %v1397_v56 = vsel %vm1176_vm4, %v3883_v54, 0.0 }
 0x3c1   : > { %v1385_v57 = vsub.f32 %v1369_v38, %v1381_v55  ;;  %1398 = vadd.xlane.f32.xlu0 %v1397_v56 }
 0x3c3   : > { %v1392_v58 = vmul.f32 1.442695, %v1385_v57 }
 0x3c5   : > { %3886 = vpow2.f32 %v1392_v58 }
 0x3c7   : > { %v3885_v59 = vpop.eup %3884 }
 0x3c8   : > { %v1400_v60 = vsel %vm1176_vm4, %v3885_v59, 0.0 }
 0x3c9   : > { %1401 = vadd.xlane.f32.xlu1 %v1400_v60 }
 0x3cf   : > { %v3887_v61 = vpop.eup %3886 }
 0x3d0   : > { %v1403_v62 = vsel %vm1176_vm4, %v3887_v61, 0.0 }
 0x3d1   : > { %1404 = vadd.xlane.f32.xlu0 %v1403_v62 }
 0x3da   : > { %902 = vperm.xlu1 %3822, %v848_v63  }
 0x3de   : > { %907 = vperm.xlu1 %3822, %v849_v0  }
 0x3e2   : > { %1619 = vperm.xlu1 %3822, %v4339_v2  }
 0x3e6   : > { %1629 = vperm.xlu1 %3822, %v4343_v4  }
 0x3e7   : > { %897 = vperm.xlu0 %3821, %v847_v5   ;;  %v3863_v5 = vld [vmem:[%s4205_s25 + $0x8] sm:$0xff]  }
 0x3ea   : > { %3824 = vset.pattern.permute.xlu1 %v4021_v47 }
 0x3eb   : > { %1614 = vperm.xlu0 %3821, %v4348_v6   ;;  %1749 = vperm.xlu1 %3824, %v4339_v2  }
 0x3ef   : > { %1624 = vperm.xlu0 %3821, %v4352_v10   ;;  %3825 = vset.pattern.permute.xlu1 %v4022_v48 }
 0x3f0   : > { %1765 = vperm.xlu1 %3825, %v4348_v6  }
 0x3f3   : > { %3823 = vset.pattern.permute.xlu0 %v4021_v47 }
 0x3f4   : > { %1745 = vperm.xlu0 %3823, %v4348_v6   ;;  %3827 = vset.pattern.permute.xlu1 %v4021_v47 }
 0x3f5   : > { %1753 = vperm.xlu1 %3827, %v4352_v10  }
 0x3f8   : > { %3826 = vset.pattern.permute.xlu0 %v4022_v48 }
 0x3f9   : > { %1769 = vperm.xlu0 %3826, %v4339_v2   ;;  %1757 = vperm.xlu1 %3827, %v4343_v4  }
 0x3fd   : > { %1773 = vperm.xlu0 %3826, %v4352_v10   ;;  %3828 = vset.pattern.permute.xlu1 %v4022_v48 }
 0x3fe   : > { %1777 = vperm.xlu1 %3828, %v4343_v4  }
 0x446   : > { %v1396_v14 = vpop.xlane.xlu1 %1395 }
 0x447   : > { %3888 = vrcp.f32 %v1396_v14  ;;  %v3866_v14 = vld [vmem:[%s4200_s18] sm:$0xff]  }
 0x44e   : > { %v1399_v15 = vpop.xlane.xlu0 %1398 }
 0x44f   : > { %3890 = vrcp.f32 %v1399_v15  ;;  %v3868_v15 = vld [vmem:[%s4225_s30] sm:$0xff]  }
 0x451   : > { %v3889_v16 = vpop.eup %3888 }
 0x452   : > { %v1410_v17 = vmul.f32 %v3889_v16, %v3881_v49  ;;  %v4023_v16 = vmov 3  }
 0x453   : > { %3830 = vset.pattern.permute.xlu1 %v4023_v16  ;;  %3829 = vset.pattern.permute.xlu0 %v4023_v16 }
 0x454   : > { %v1418_v18 = vpack.c.bf16 %v1410_v17, %v1410_v17  ;;  %v3867_v17 = vld [vmem:[%s4200_s18 + $0x8] sm:$0xff]   ;;  %1799 = vperm.xlu1 %3830, %v4339_v2   ;;  %1795 = vperm.xlu0 %3829, %v4348_v6  }
 0x456   : > { %v1402_v19 = vpop.xlane.xlu1 %1401  ;;  %v1426_v20 = vsel %vm1176_vm4, %v1418_v18, 0  ;;  %v3869_v18 = vld [vmem:[%s4225_s30 + $0x8] sm:$0xff]  }
 0x457   : > { %3892 = vrcp.f32 %v1402_v19  ;;  %3603 = vmatpush3.bf16.xpose.msra.mxu0 %v1426_v20  ;;  %v1883_v19 = vld [vmem:[%s4230_s19] sm:$0xff]  ;;  %v1884_v20 = vld [vmem:[%s4230_s19 + $0x8] sm:$0xff] }
 0x458   : > { %3614 = vmatprep.subr.bf16.mxu0 %v4019_v26  ;;  %1803 = vperm.xlu1 %3830, %v4352_v10  }
 0x459   : > { %v3891_v22 = vpop.eup %3890  ;;  %1807 = vperm.xlu0 %3829, %v4343_v4  }
 0x45a   : > { %v1411_v23 = vmul.f32 %v3891_v22, %v3883_v54  ;;  %v903_v32 = vpop.permute.xlu1 %902  ;;  %v1886_v22 = vld [vmem:[%s4230_s19 + $0x18] sm:$0xff] }
 0x45b   : > { %v1034_v36 = vadd.f32 %v4330_v41, %v903_v32  ;;  %v3862_v41 = vld [vmem:[%s4205_s25] sm:$0xff]  }
 0x45c   : > { %v1419_v25 = vpack.c.bf16 %v1411_v23, %v1411_v23  ;;  %3831 = vset.pattern.permute.xlu1 %v4018_v12 }
 0x45d   : > { %v1416_v40 = vpack.c.bf16 %v1034_v36, %v1034_v36  ;;  %3832 = vset.pattern.permute.xlu0 %v4018_v12  ;;  %1893 = vperm.xlu1 %3831, %v1883_v19  }
 0x45e   : > { %3605 = vmatmul.mubr.msk.bf16.vlgmr.msra.gmra.mrb[12].mxu0 %vm1176_vm4, %v1414_v24  ;;  %v1405_v27 = vpop.xlane.xlu0 %1404  ;;  %v1472_v28 = vsel %vm1176_vm4, %v1419_v25, 0  ;;  %v908_v43 = vpop.permute.xlu1 %907  ;;  %1898 = vperm.xlu0 %3832, %v1884_v20  }
 0x45f   : > { %3894 = vrcp.f32 %v1405_v27  ;;  %3609 = vmatpush3.bf16.xpose.msra.mxu1 %v1472_v28  ;;  %3616 = vmatprep.mubr.msk.bf16.mxu0 %vm4020_vm2, %v4019_v26  ;;  %v1037_v45 = vadd.f32 %v3577_v1, %v908_v43 }
 0x460   : > { %3620 = vmatprep.subr.bf16.mxu1 %v4019_v26 }
 0x461   : > { %v3893_v29 = vpop.eup %3892  ;;  %v1417_v46 = vpack.c.bf16 %v1037_v45, %v1037_v45  ;;  %1903 = vperm.xlu1 %3831, %v1885_v21  }
 0x462   : > { %v1412_v30 = vmul.f32 %v3893_v29, %v3885_v59  ;;  %v1620_v24 = vpop.permute.xlu1 %1619 }
 0x464   : > { %v1420_v31 = vpack.c.bf16 %v1412_v30, %v1412_v30 }
 0x465   : > { %1908 = vperm.xlu1 %3831, %v1886_v22  }
 0x466   : > { %v898_v33 = vpop.permute.xlu0 %897  ;;  %v1518_v34 = vsel %vm1176_vm4, %v1420_v31, 0  ;;  %v1630_v32 = vpop.permute.xlu1 %1629 }
 0x467   : > { %v1029_v35 = vadd.f32 %v1028_v3, %v898_v33  ;;  %3615 = vmatpush3.bf16.xpose.msra.mxu0 %v1518_v34 }
 0x469   : > { %v3895_v37 = vpop.eup %3894  ;;  %v1415_v38 = vpack.c.bf16 %v1029_v35, %v1029_v35 }
 0x46a   : > { %v1413_v39 = vmul.f32 %v3895_v37, %v3887_v61  ;;  %v1615_v23 = vpop.permute.xlu0 %1614 }
 0x46b   : > { %3611 = vmatmul.mubr.msk.bf16.vlgmr.msra.gmra.mrb[16].mxu1 %vm1176_vm4, %v1415_v38 }
 0x46c   : > { %v1421_v42 = vpack.c.bf16 %v1413_v39, %v1413_v39  ;;  %3622 = vmatprep.mubr.msk.bf16.mxu1 %vm4020_vm2, %v4019_v26 }
 0x46e   : > { %3617 = vmatmul.mubr.msk.bf16.vlgmr.msra.gmra.mrb[16].mxu0 %vm1176_vm4, %v1416_v40  ;;  %v1564_v44 = vsel %vm1176_vm4, %v1421_v42, 0  ;;  %v1625_v27 = vpop.permute.xlu0 %1624 }
 0x46f   : > { %3621 = vmatpush3.bf16.xpose.msra.mxu1 %v1564_v44  ;;  %3630 = vmatprep.mubr.msk.bf16.mxu0 %vm940_vm1, %v3862_v41 }
 0x473   : > { %v1746_v21 = vpop.permute.xlu0 %1745 }
 0x476   : > { %3623 = vmatmul.mubr.msk.bf16.vlgmr.msra.gmra.mrb[20].mxu1 %vm1176_vm4, %v1417_v46 }
 0x477   : > { %3638 = vmatprep.mubr.msk.bf16.mxu1 %vm940_vm1, %v3864_v13 }
 0x531   : > { %v1462_v49 = vpop.f32.mrb[12].mxu0 }
 0x532   : > { %v3606_v50 = vpop.f32.mrb[13].mxu0 }
 0x533   : > { %v1465_v51 = vpop.f32.mrb[14].mxu0 }
 0x534   : > { %v3607_v52 = vpop.f32.mrb[15].mxu0 }
 0x53e   : > { %v1508_v53 = vpop.f32.mrb[16].mxu1 }
 0x53f   : > { %v1610_v54 = vpack.c.bf16 %v1508_v53, %v1462_v49  ;;  %v3612_v55 = vpop.f32.mrb[17].mxu1 }
 0x540   : > { %v1511_v56 = vpop.f32.mrb[18].mxu1 }
 0x541   : > { %v3613_v57 = vpop.f32.mrb[19].mxu1  ;;  %v1554_v58 = vpop.f32.mrb[16].mxu0  ;;  %3626 = vmatprep.subr.bf16.mxu0 %v1610_v54 }
 0x542   : > { %v3618_v59 = vpop.f32.mrb[17].mxu0  ;;  %3627 = vmatpush3.bf16.msra.mxu0 %v1610_v54 }
 0x543   : > { %v1557_v60 = vpop.f32.mrb[18].mxu0 }
 0x544   : > { %v3619_v61 = vpop.f32.mrb[19].mxu0 }
 0x549   : > { %v1600_v62 = vpop.f32.mrb[20].mxu1 }
 0x54a   : > { %v1611_v63 = vpack.c.bf16 %v1600_v62, %v1554_v58  ;;  %v3624_v0 = vpop.f32.mrb[21].mxu1 }
 0x54b   : > { %v1603_v1 = vpop.f32.mrb[22].mxu1 }
 0x54c   : > { %v3625_v3 = vpop.f32.mrb[23].mxu1  ;;  %3628 = vmatprep.subr.bf16.mxu0 %v1611_v63 }
 0x54d   : > { %3629 = vmatpush3.bf16.msra.mxu0 %v1611_v63 }
 0x54e   : > { %3642 = vmatprep.subr.bf16.mxu0 %v3866_v14 }
 0x550   : > { %3631 = vmatmul.mubr.msk.bf16.vlgmr.msra.gmra.mrb[20].mxu0 %vm940_vm1, %v3863_v5  ;;  %v1750_v5 = vpop.permute.xlu1 %1749 }
 0x551   : > { %3646 = vmatprep.mubr.msk.bf16.mxu0 %vm940_vm1, %v3868_v15  ;;  %3643 = vmatpush3.bf16.msra.mxu0 %v3866_v14 }
 0x552   : > { %3644 = vmatprep.subr.bf16.mxu0 %v3867_v17 }
 0x555   : > { %3645 = vmatpush3.bf16.msra.mxu0 %v3867_v17  ;;  %v1766_v17 = vpop.permute.xlu1 %1765 }
 0x556   : > { %3666 = vmatprep.subr.bf16.mxu0 %v4019_v26 }
 0x558   : > { %3647 = vmatmul.mubr.msk.bf16.vlgmr.msra.gmra.mrb[24].mxu0 %vm940_vm1, %v3869_v18 }
 0x559   : > { %v1754_v20 = vpop.permute.xlu1 %1753 }
 0x55d   : > { %v1758_v22 = vpop.permute.xlu1 %1757 }
 0x623   : > { %v3632_v25 = vpop.f32.mrb[20].mxu0 }
 0x624   : > { %v1682_v28 = vpop.f32.mrb[21].mxu0  ;;  %v1691_v29 = vadd.f32 %v3632_v25, %v1625_v27 }
 0x625   : > { %v1683_v30 = vadd.f32 %v1682_v28, %v1615_v23  ;;  %v3633_v31 = vpop.f32.mrb[22].mxu0  ;;  %v1770_v23 = vpop.permute.xlu0 %1769 }
 0x626   : > { %v1685_v33 = vpop.f32.mrb[23].mxu0  ;;  %v1694_v35 = vadd.f32 %v3633_v31, %v1630_v32  ;;  %v1699_v37 = vadd.f32 %v1691_v29, %v4266_v9 }
 0x627   : > { %v1697_v34 = vadd.f32 %v1683_v30, %v4262_v7  ;;  %v1686_v36 = vadd.f32 %v1685_v33, %v1620_v24  ;;  %v1778_v30 = vpop.permute.xlu1 %1777 }
 0x628   : > { %v1700_v40 = vadd.f32 %v1694_v35, %v4270_v11  ;;  %v1704_v44 = vsel %vm1176_vm4, %v1699_v37, 0.0 }
 0x629   : > { %v1698_v38 = vadd.f32 %v1686_v36, %v4264_v8  ;;  %v1701_v39 = vsel %vm1176_vm4, %v1697_v34, 0.0  ;;  %v1774_v31 = vpop.permute.xlu0 %1773 }
 0x62a   : > { %v1706_v46 = vsel %vm1176_vm4, %v1700_v40, 0.0 }
 0x62b   : > { %v1702_v42 = vsel %vm1176_vm4, %v1698_v38, 0.0 }
 0x62c   : > { %v1703_v43 = vadd.f32 %v1702_v42, %v1701_v39 }
 0x62e   : > { %v1705_v45 = vadd.f32 %v1704_v44, %v1703_v43  ;;  %v3865_v43 = vld [vmem:[%s4215_s16 + $0x8] sm:$0xff]   ;;  %v1800_v44 = vpop.permute.xlu1 %1799 }
 0x630   : > { %v1707_v41 = vadd.f32 %v1706_v46, %v1705_v45 }
 0x632   : > { %v1708_v7 = vrot.slane %v1707_v41, 4  ;;  %v1804_v45 = vpop.permute.xlu1 %1803 }
 0x634   : > { %v1709_v47 = vadd.f32 %v1708_v7, %v1707_v41  ;;  %v3870_v41 = vld [vmem:[%s4225_s30 + $0x10] sm:$0xff]   ;;  %v3871_v7 = vld [vmem:[%s4225_s30 + $0x18] sm:$0xff]  }
 0x635   : > { %3650 = vmatprep.mubr.msk.bf16.mxu0 %vm940_vm1, %v3870_v41 }
 0x636   : > { %v1710_v48 = vrot.slane %v1709_v47, 2  ;;  %v1894_v46 = vpop.permute.xlu1 %1893  ;;  %3651 = vmatmul.mubr.msk.bf16.gmra.mrb[28].mxu0 %vm940_vm1, %v3871_v7 }
 0x637   : > { %3668 = vmatprep.mubr.msk.bf16.mxu0 %vm4020_vm2, %v4019_v26 }
 0x638   : > { %v1711_v49 = vadd.f32 %v1710_v48, %v1709_v47  ;;  %v3648_v47 = vpop.f32.mrb[24].mxu0 }
 0x63a   : > { %v1712_v9 = vrot.slane %v1711_v49, 1  ;;  %v1904_v48 = vpop.permute.xlu1 %1903 }
 0x63c   : > { %v1713_v50 = vadd.f32 %v1712_v9, %v1711_v49  ;;  %v2009_v49 = vpop.f32.mrb[25].mxu0  ;;  %v2018_v9 = vadd.f32 %v3648_v47, %v1904_v48 }
 0x63e   : > { %v1715_v8 = vmul.f32 0.03125, %v1713_v50  ;;  %v2010_v50 = vadd.f32 %v2009_v49, %v1894_v46 }
 0x640   : > { %v1718_v51 = vsub.f32 %v1699_v37, %v1715_v8  ;;  %v1719_v52 = vsub.f32 %v1700_v40, %v1715_v8  ;;  %v1716_v53 = vsub.f32 %v1697_v34, %v1715_v8  ;;  %v1717_v11 = vsub.f32 %v1698_v38, %v1715_v8  ;;  %v3649_v8 = vpop.f32.mrb[26].mxu0 }
 0x642   : > { %v1720_v54 = vmul.f32 %v1716_v53, %v1716_v53  ;;  %v1721_v55 = vmul.f32 %v1717_v11, %v1717_v11  ;;  %v1722_v56 = vmul.f32 %v1718_v51, %v1718_v51  ;;  %v1723_v57 = vmul.f32 %v1719_v52, %v1719_v52 }
 0x644   : > { %v1724_v58 = vsel %vm1176_vm4, %v1720_v54, 0.0  ;;  %v1725_v59 = vsel %vm1176_vm4, %v1721_v55, 0.0  ;;  %v1727_v61 = vsel %vm1176_vm4, %v1722_v56, 0.0  ;;  %v1729_v63 = vsel %vm1176_vm4, %v1723_v57, 0.0  ;;  %v1796_v55 = vpop.permute.xlu0 %1795 }
 0x645   : > { %v1726_v60 = vadd.f32 %v1725_v59, %v1724_v58 }
 0x647   : > { %v1728_v62 = vadd.f32 %v1727_v61, %v1726_v60 }
 0x648   : > { %v1808_v58 = vpop.permute.xlu0 %1807 }
 0x649   : > { %v1730_v0 = vadd.f32 %v1729_v63, %v1728_v62 }
 0x64b   : > { %v1731_v1 = vrot.slane %v1730_v0, 4 }
 0x64d   : > { %v1732_v3 = vadd.f32 %v1731_v1, %v1730_v0 }
 0x64f   : > { %v1733_v13 = vrot.slane %v1732_v3, 2 }
 0x651   : > { %v1734_v14 = vadd.f32 %v1733_v13, %v1732_v3 }
 0x653   : > { %v1735_v15 = vrot.slane %v1734_v14, 1 }
 0x655   : > { %v1736_v16 = vadd.f32 %v1735_v15, %v1734_v14  ;;  %v1899_v15 = vpop.permute.xlu0 %1898 }
 0x657   : > { %v1737_v18 = vmul.f32 0.03125, %v1736_v16 }
 0x659   : > { %v1738_v19 = vadd.f32 1e-05, %v1737_v18  ;;  %v1909_v18 = vpop.permute.xlu1 %1908 }
 0x65b   : > { %3896 = vrsqrt.f32 %v1738_v19 }
 0x665   : > { %v3897_v24 = vpop.eup %3896 }
 0x666   : > { %v1741_v25 = vmul.f32 %v3897_v24, %v1717_v11  ;;  %v1742_v27 = vmul.f32 %v3897_v24, %v1718_v51  ;;  %v1740_v28 = vmul.f32 %v3897_v24, %v1716_v53  ;;  %v1743_v29 = vmul.f32 %v3897_v24, %v1719_v52  ;;  %v2012_v51 = vpop.f32.mrb[27].mxu0 }
 0x667   : > { %v2174_v52 = vpack.c.bf16 %v2018_v9, %v2018_v9  ;;  %v2172_v53 = vpack.c.bf16 %v2010_v50, %v2010_v50  ;;  %v2013_v16 = vadd.f32 %v2012_v51, %v1899_v15 }
 0x668   : > { %v1761_v32 = vmul.f32 %v1750_v5, %v1741_v25  ;;  %v1762_v33 = vmul.f32 %v1754_v20, %v1742_v27  ;;  %v1760_v34 = vmul.f32 %v1746_v21, %v1740_v28  ;;  %v1763_v35 = vmul.f32 %v1758_v22, %v1743_v29 }
 0x669   : > { %v2272_v11 = vsel %vm1180_vm3, %v2174_v52, 0  ;;  %v2180_v54 = vsel %vm1180_vm3, %v2172_v53, 0  ;;  %v2021_v21 = vadd.f32 %v3649_v8, %v1909_v18 }
 0x66a   : > { %v4413_v36 = vadd.f32 %v1766_v17, %v1760_v34  ;;  %v4415_v37 = vadd.f32 %v1770_v23, %v1761_v32  ;;  %v4417_v38 = vadd.f32 %v1778_v30, %v1763_v35  ;;  %v4419_v39 = vadd.f32 %v1774_v31, %v1762_v33  ;;  %3667 = vmatpush3.bf16.msra.mxu0 %v2272_v11  ;;  %v823_v34 = vld [vmem:[%s4712_s15] sm:$0xff] }
 0x66b   : > { %3678 = vmatprep.subr.bf16.mxu0 %v4019_v26  ;;  %v2173_v17 = vpack.c.bf16 %v2013_v16, %v2013_v16  ;;  %v2175_v27 = vpack.c.bf16 %v2021_v21, %v2021_v21 }
 0x66c   : > { %v1792_v40 = vpack.c.bf16 %v4415_v37, %v4413_v36  ;;  %v1793_v42 = vpack.c.bf16 %v4417_v38, %v4419_v39 }
 0x66d   : > { %v2226_v22 = vsel %vm1180_vm3, %v2173_v17, 0  ;;  %v2318_v30 = vsel %vm1180_vm3, %v2175_v27, 0 }
 0x66e   : > { %3634 = vmatprep.subr.bf16.mxu1 %v1792_v40 }
 0x66f   : > { %3635 = vmatpush3.bf16.msra.mxu1 %v1792_v40 }
 0x670   : > { %3636 = vmatprep.subr.bf16.mxu1 %v1793_v42 }
 0x673   : > { %3637 = vmatpush3.bf16.msra.mxu1 %v1793_v42 }
 0x674   : > { %3654 = vmatprep.subr.bf16.mxu1 %v4019_v26 }
 0x676   : > { %3639 = vmatmul.mubr.msk.bf16.vlgmr.msra.gmra.mrb[24].mxu1 %vm940_vm1, %v3865_v43 }
 0x677   : > { %3656 = vmatprep.mubr.msk.bf16.mxu1 %vm4020_vm2, %v4019_v26  ;;  %3655 = vmatpush3.bf16.msra.mxu1 %v2180_v54 }
 0x678   : > { %3660 = vmatprep.subr.bf16.mxu1 %v4019_v26 }
 0x709   : > { %v4440_v3 = vpop.f32.mrb[28].mxu0 }
 0x70a   : > { %v4442_v5 = vpop.f32.mrb[29].mxu0 }
 0x70b   : > { %v4444_v13 = vpop.f32.mrb[30].mxu0 }
 0x70c   : > { %v4446_v14 = vpop.f32.mrb[31].mxu0 }
 0x749   : > { %v3640_v56 = vpop.f32.mrb[24].mxu1 }
 0x74a   : > { %v1860_v57 = vpop.f32.mrb[25].mxu1  ;;  %v1869_v61 = vadd.f32 %v3640_v56, %v1804_v45 }
 0x74b   : > { %v1861_v59 = vadd.f32 %v1860_v57, %v1796_v55  ;;  %v3641_v60 = vpop.f32.mrb[26].mxu1 }
 0x74c   : > { %v1872_v62 = vadd.f32 %v3641_v60, %v1808_v58  ;;  %v1863_v63 = vpop.f32.mrb[27].mxu1 }
 0x74d   : > { %v1864_v0 = vadd.f32 %v1863_v63, %v1800_v44  ;;  %2040 = vxpose.xlu0.b32.start.end [1/1] (short) (narrow) %v1861_v59, 8 }
 0x74e   : > { %v3833_v1 = vpack.i.bf16 %v1872_v62, %v1869_v61  ;;  %v1888_v62 = vld [vmem:[%s4230_s19 + $0x28] sm:$0xff] }
 0x74f   : > { %2072 = vxpose.xlu1.b32.start.end [1/1] (short) (narrow) %v1864_v0, 8 }
 0x751   : > { %3834 = vxpose.xlu0.b32.start.end [1/1] (short) (narrow) %v3833_v1, 8 }
 0x7cd   : > { %v2056_v19 = vpop.trf.xlu0 }
 0x7ce   : > { %v2168_v20 = vpack.c.bf16 %v2056_v19, %v2056_v19 }
 0x7cf   : > { %v2088_v24 = vpop.trf.xlu1 }
 0x7d0   : > { %3657 = vmatmul.mubr.msk.bf16.vlgmr.msra.gmra.mrb[28].mxu1 %vm1176_vm4, %v2168_v20  ;;  %v2169_v29 = vpack.c.bf16 %v2088_v24, %v2088_v24 }
 0x7d1   : > { %3661 = vmatpush3.bf16.msra.mxu1 %v2226_v22  ;;  %v3835_v23 = vpop.trf.xlu0  ;;  %3662 = vmatprep.mubr.msk.bf16.mxu1 %vm4020_vm2, %v4019_v26 }
 0x7d2   : > { %v3836_v25 = vunpack.i.l.bf16 %v3835_v23  ;;  %3672 = vmatprep.subr.bf16.mxu1 %v4019_v26  ;;  %v3839_v31 = vunpack.i.h.bf16 %v3835_v23 }
 0x7d4   : > { %v2170_v28 = vpack.c.bf16 %v3836_v25, %v3836_v25  ;;  %v2171_v32 = vpack.c.bf16 %v3839_v31, %v3839_v31 }
 0x7d6   : > { %3669 = vmatmul.mubr.msk.bf16.vlgmr.msra.gmra.mrb[32].mxu0 %vm1176_vm4, %v2170_v28 }
 0x7d7   : > { %3680 = vmatprep.mubr.msk.bf16.mxu0 %vm4020_vm2, %v4019_v26 }
 0x7d8   : > { %3663 = vmatmul.mubr.msk.bf16.vlgmr.msra.gmra.mrb[32].mxu1 %vm1176_vm4, %v2169_v29 }
 0x7d9   : > { %3673 = vmatpush3.bf16.msra.mxu1 %v2318_v30  ;;  %3674 = vmatprep.mubr.msk.bf16.mxu1 %vm4020_vm2, %v4019_v26 }
 0x7da   : > { %3684 = vmatprep.subr.bf16.mxu1 %v4019_v26 }
 0x7e0   : > { %3675 = vmatmul.mubr.msk.bf16.vlgmr.msra.gmra.mrb[36].mxu1 %vm1176_vm4, %v2171_v32 }
 0x7e1   : > { %3686 = vmatprep.mubr.msk.bf16.mxu1 %vm4020_vm2, %v4019_v26 }
 0x8a3   : > { %v2216_v33 = vpop.f32.mrb[28].mxu1 }
 0x8a4   : > { %v2360_v35 = vmul.f32 0.35355338, %v2216_v33  ;;  %v3658_v40 = vpop.f32.mrb[29].mxu1  ;;  %v1887_v33 = vld [vmem:[%s4230_s19 + $0x20] sm:$0xff] }
 0x8a5   : > { %v2219_v42 = vpop.f32.mrb[30].mxu1 }
 0x8a6   : > { %v3659_v43 = vpop.f32.mrb[31].mxu1  ;;  %v2364_v44 = vadd.f32 %v2360_v35, %v823_v34  ;;  %v1890_v35 = vld [vmem:[%s4230_s19 + $0x38] sm:$0xff] }
 0x8a8   : > { %v2368_v45 = vsel %vm1176_vm4, %v2364_v44, -inf }
 0x8a9   : > { %2369 = vmax.xlane.f32.xlu0 %v2368_v45  ;;  %v2308_v46 = vpop.f32.mrb[32].mxu0 }
 0x8aa   : > { %v2362_v41 = vmul.f32 0.35355338, %v2308_v46  ;;  %v3670_v7 = vpop.f32.mrb[33].mxu0 }
 0x8ab   : > { %v2262_v47 = vpop.f32.mrb[32].mxu1  ;;  %v2311_v48 = vpop.f32.mrb[34].mxu0 }
 0x8ac   : > { %v2361_v49 = vmul.f32 0.35355338, %v2262_v47  ;;  %v3664_v9 = vpop.f32.mrb[33].mxu1  ;;  %v3671_v50 = vpop.f32.mrb[35].mxu0  ;;  %v2366_v8 = vadd.f32 %v2362_v41, %v823_v34 }
 0x8ad   : > { %v2265_v51 = vpop.f32.mrb[34].mxu1 }
 0x8ae   : > { %v3665_v52 = vpop.f32.mrb[35].mxu1  ;;  %v2374_v53 = vsel %vm1176_vm4, %v2366_v8, -inf  ;;  %v2365_v11 = vadd.f32 %v2361_v49, %v823_v34 }
 0x8af   : > { %2375 = vmax.xlane.f32.xlu0 %v2374_v53 }
 0x8b0   : > { %v2371_v54 = vsel %vm1176_vm4, %v2365_v11, -inf }
 0x8b1   : > { %2372 = vmax.xlane.f32.xlu1 %v2371_v54 }
 0x8b3   : > { %v2354_v55 = vpop.f32.mrb[36].mxu1 }
 0x8b4   : > { %v2363_v56 = vmul.f32 0.35355338, %v2354_v55  ;;  %v3676_v57 = vpop.f32.mrb[37].mxu1 }
 0x8b5   : > { %v2357_v58 = vpop.f32.mrb[38].mxu1 }
 0x8b6   : > { %v3677_v59 = vpop.f32.mrb[39].mxu1  ;;  %v2367_v60 = vadd.f32 %v2363_v56, %v823_v34  ;;  %v1889_v34 = vld [vmem:[%s4230_s19 + $0x30] sm:$0xff] }
 0x8b8   : > { %v2377_v61 = vsel %vm1176_vm4, %v2367_v60, -inf }
 0x8b9   : > { %2378 = vmax.xlane.f32.xlu1 %v2377_v61 }
 0x8ca   : > { %1918 = vperm.xlu1 %3831, %v1888_v62  }
 0x936   : > { %v2370_v63 = vpop.xlane.xlu0 %2369 }
 0x937   : > { %v2380_v0 = vsub.f32 %v2364_v44, %v2370_v63 }
 0x939   : > { %v2384_v16 = vmul.f32 1.442695, %v2380_v0 }
 0x93c   : > { %v2376_v1 = vpop.xlane.xlu0 %2375 }
 0x93d   : > { %v2382_v15 = vsub.f32 %v2366_v8, %v2376_v1 }
 0x93e   : > { %v2373_v17 = vpop.xlane.xlu1 %2372 }
 0x93f   : > { %v2388_v18 = vmul.f32 1.442695, %v2382_v15  ;;  %v2381_v19 = vsub.f32 %v2365_v11, %v2373_v17  ;;  %v3872_v15 = vld [vmem:[%s4235_s5] sm:$0xff]  }
 0x941   : > { %3898 = vpow2.f32 %v2388_v18  ;;  %v2386_v20 = vmul.f32 1.442695, %v2381_v19 }
 0x942   : > { %3900 = vpow2.f32 %v2384_v16 }
 0x943   : > { %3902 = vpow2.f32 %v2386_v20 }
 0x946   : > { %v2379_v21 = vpop.xlane.xlu1 %2378 }
 0x947   : > { %v2383_v22 = vsub.f32 %v2367_v60, %v2379_v21 }
 0x949   : > { %v2390_v23 = vmul.f32 1.442695, %v2383_v22 }
 0x94a   : > { %v1919_v40 = vpop.permute.xlu1 %1918 }
 0x94b   : > { %v3899_v24 = vpop.eup %3898  ;;  %3904 = vpow2.f32 %v2390_v23  ;;  %v2029_v51 = vadd.f32 %v4446_v14, %v1919_v40  ;;  %v2791_v40 = vld [vmem:[%s4245_s2 + $0x20] sm:$0xff] }
 0x94c   : > { %v3901_v25 = vpop.eup %3900  ;;  %v2398_v27 = vsel %vm1176_vm4, %v3899_v24, 0.0 }
 0x94d   : > { %v3903_v28 = vpop.eup %3902  ;;  %2399 = vadd.xlane.f32.xlu0 %v2398_v27  ;;  %v2392_v30 = vsel %vm1176_vm4, %v3901_v25, 0.0  ;;  %v2413_v56 = vpack.c.bf16 %v2029_v51, %v2029_v51 }
 0x94e   : > { %v2395_v29 = vsel %vm1176_vm4, %v3903_v28, 0.0 }
 0x94f   : > { %2396 = vadd.xlane.f32.xlu1 %v2395_v29 }
 0x951   : > { %2393 = vadd.xlane.f32.xlu0 %v2392_v30  ;;  %v3873_v30 = vld [vmem:[%s4235_s5 + $0x8] sm:$0xff]   ;;  %s4713_s5 = sld [smem:[#allocation9_spill]] }
 0x955   : > { %v3905_v31 = vpop.eup %3904 }
 0x956   : > { %v2401_v32 = vsel %vm1176_vm4, %v3905_v31, 0.0 }
 0x957   : > { %2402 = vadd.xlane.f32.xlu1 %v2401_v32  ;;  %v2788_v32 = vld [vmem:[%s4245_s2 + $0x8] sm:$0xff]  ;;  %p3477_p1 = scmp.ne.s32.totalorder %s4713_s5, 1 }
 0x967   : > { %1913 = vperm.xlu0 %3832, %v1887_v33   ;;  %v2787_v33 = vld [vmem:[%s4245_s2] sm:$0xff] }
 0x968   : > { %1923 = vperm.xlu1 %3831, %v1889_v34   ;;  %v2789_v34 = vld [vmem:[%s4245_s2 + $0x10] sm:$0xff] }
 0x96b   : > { %1928 = vperm.xlu0 %3832, %v1890_v35   ;;  %v2790_v35 = vld [vmem:[%s4245_s2 + $0x18] sm:$0xff] }
 0x9da   : > { %v2400_v42 = vpop.xlane.xlu0 %2399 }
 0x9dc   : > { %v2397_v43 = vpop.xlane.xlu1 %2396 }
 0x9dd   : > { %3906 = vrcp.f32 %v2397_v43  ;;  %v2793_v43 = vld [vmem:[%s4245_s2 + $0x30] sm:$0xff] }
 0x9de   : > { %v2394_v44 = vpop.xlane.xlu0 %2393 }
 0x9df   : > { %3908 = vrcp.f32 %v2394_v44  ;;  %v2794_v44 = vld [vmem:[%s4245_s2 + $0x38] sm:$0xff] }
 0x9e0   : > { %3910 = vrcp.f32 %v2400_v42  ;;  %v2792_v42 = vld [vmem:[%s4245_s2 + $0x28] sm:$0xff] }
 0x9e4   : > { %v2403_v45 = vpop.xlane.xlu1 %2402 }
 0x9e5   : > { %3912 = vrcp.f32 %v2403_v45 }
 0x9e6   : > { %v1914_v8 = vpop.permute.xlu0 %1913 }
 0x9e7   : > { %v3907_v46 = vpop.eup %3906  ;;  %v2026_v54 = vadd.f32 %v4442_v5, %v1914_v8 }
 0x9e8   : > { %v2409_v41 = vmul.f32 %v3907_v46, %v3903_v28  ;;  %v1924_v61 = vpop.permute.xlu1 %1923 }
 0x9e9   : > { %v3909_v7 = vpop.eup %3908  ;;  %v2412_v60 = vpack.c.bf16 %v2026_v54, %v2026_v54  ;;  %v2034_v63 = vadd.f32 %v4440_v3, %v1924_v61  ;;  %v4026_v3 = vmov 6  }
 0x9ea   : > { %v2417_v47 = vpack.c.bf16 %v2409_v41, %v2409_v41  ;;  %v2408_v48 = vmul.f32 %v3909_v7, %v3901_v25  ;;  %v3911_v49 = vpop.eup %3910  ;;  %v1929_v59 = vpop.permute.xlu0 %1928 }
 0x9eb   : > { %v2410_v53 = vmul.f32 %v3911_v49, %v3899_v24  ;;  %v2037_v5 = vadd.f32 %v4444_v13, %v1929_v59  ;;  %v2414_v1 = vpack.c.bf16 %v2034_v63, %v2034_v63  ;;  %v4024_v13 = vmov 4  }
 0x9ec   : > { %v2470_v9 = vsel %vm1176_vm4, %v2417_v47, 0  ;;  %v2416_v50 = vpack.c.bf16 %v2408_v48, %v2408_v48  ;;  %3840 = vset.pattern.permute.xlu1 %v4024_v13  ;;  %3841 = vset.pattern.permute.xlu0 %v4024_v13 }
 0x9ed   : > { %3685 = vmatpush3.bf16.xpose.msra.mxu1 %v2470_v9  ;;  %v2418_v58 = vpack.c.bf16 %v2410_v53, %v2410_v53  ;;  %v2415_v0 = vpack.c.bf16 %v2037_v5, %v2037_v5  ;;  %2611 = vperm.xlu1 %3840, %v4348_v6  }
 0x9ee   : > { %v2424_v52 = vsel %vm1176_vm4, %v2416_v50, 0  ;;  %3696 = vmatprep.subr.bf16.mxu1 %v4019_v26  ;;  %2615 = vperm.xlu0 %3841, %v4339_v2  }
 0x9ef   : > { %v3913_v11 = vpop.eup %3912  ;;  %3679 = vmatpush3.bf16.xpose.msra.mxu0 %v2424_v52  ;;  %v2516_v62 = vsel %vm1176_vm4, %v2418_v58, 0 }
 0x9f0   : > { %v2411_v55 = vmul.f32 %v3913_v11, %v3905_v31  ;;  %3690 = vmatprep.subr.bf16.mxu0 %v4019_v26  ;;  %v3874_v31 = vld [vmem:[%s4240_s28] sm:$0xff]  }
 0x9f1   : > { %2619 = vperm.xlu1 %3840, %v4352_v10  }
 0x9f2   : > { %v2419_v57 = vpack.c.bf16 %v2411_v55, %v2411_v55 }
 0x9f4   : > { %3687 = vmatmul.mubr.msk.bf16.vlgmr.msra.gmra.mrb[40].mxu1 %vm1176_vm4, %v2413_v56  ;;  %v2562_v14 = vsel %vm1176_vm4, %v2419_v57, 0 }
 0x9f5   : > { %3697 = vmatpush3.bf16.xpose.msra.mxu1 %v2562_v14  ;;  %3698 = vmatprep.mubr.msk.bf16.mxu1 %vm4020_vm2, %v4019_v26 }
 0x9f6   : > { %3681 = vmatmul.mubr.msk.bf16.vlgmr.msra.gmra.mrb[36].mxu0 %vm1176_vm4, %v2412_v60  ;;  %2623 = vperm.xlu1 %3840, %v4343_v4  }
 0x9f7   : > { %3691 = vmatpush3.bf16.xpose.msra.mxu0 %v2516_v62  ;;  %3692 = vmatprep.mubr.msk.bf16.mxu0 %vm4020_vm2, %v4019_v26  ;;  %v4025_v26 = vmov 5  }
 0x9f8   : > { %3842 = vset.pattern.permute.xlu0 %v4025_v26 }
 0x9f9   : > { %2738 = vperm.xlu0 %3842, %v4348_v6  }
 0x9fa   : > { %3843 = vset.pattern.permute.xlu1 %v4025_v26 }
 0x9fb   : > { %2742 = vperm.xlu1 %3843, %v4339_v2  }
 0x9fc   : > { %3699 = vmatmul.mubr.msk.bf16.vlgmr.msra.gmra.mrb[44].mxu1 %vm1176_vm4, %v2415_v0 }
 0x9fd   : > { %3845 = vset.pattern.permute.xlu0 %v4026_v3  ;;  %3714 = vmatprep.mubr.msk.bf16.mxu1 %vm940_vm1, %v3874_v31 }
 0x9fe   : > { %3693 = vmatmul.mubr.msk.bf16.vlgmr.msra.gmra.mrb[40].mxu0 %vm1176_vm4, %v2414_v1  ;;  %2762 = vperm.xlu0 %3845, %v4339_v2  }
 0x9ff   : > { %3706 = vmatprep.mubr.msk.bf16.mxu0 %vm940_vm1, %v3872_v15  ;;  %3844 = vset.pattern.permute.xlu1 %v4026_v3 }
 0xa00   : > { %2758 = vperm.xlu1 %3844, %v4348_v6  }
 0xa02   : > { %2766 = vperm.xlu0 %3845, %v4352_v10  }
 0xa04   : > { %3846 = vset.pattern.permute.xlu1 %v4025_v26 }
 0xa05   : > { %2746 = vperm.xlu1 %3846, %v4352_v10  }
 0xa06   : > { %3848 = vset.pattern.permute.xlu0 %v4018_v12 }
 0xa07   : > { %2797 = vperm.xlu0 %3848, %v2787_v33  }
 0xa09   : > { %2750 = vperm.xlu1 %3846, %v4343_v4  }
 0xa0b   : > { %2812 = vperm.xlu0 %3848, %v2790_v35  }
 0xa0d   : > { %3847 = vset.pattern.permute.xlu1 %v4026_v3 }
 0xa0e   : > { %2770 = vperm.xlu1 %3847, %v4343_v4  }
 0xa0f   : > { %2822 = vperm.xlu0 %3848, %v2792_v42  }
 0xa12   : > { %3849 = vset.pattern.permute.xlu1 %v4018_v12 }
 0xa13   : > { %2802 = vperm.xlu1 %3849, %v2788_v32   ;;  %2832 = vperm.xlu0 %3848, %v2794_v44  }
 0xa17   : > { %2807 = vperm.xlu1 %3849, %v2789_v34  }
 0xa1b   : > { %2817 = vperm.xlu1 %3849, %v2791_v40  }
 0xa1f   : > { %2827 = vperm.xlu1 %3849, %v2793_v43  }
 0xa6c   : > { %v2612_v45 = vpop.permute.xlu1 %2611 }
 0xa6d   : > { %v2616_v47 = vpop.permute.xlu0 %2615 }
 0xa70   : > { %v2620_v46 = vpop.permute.xlu1 %2619 }
 0xa75   : > { %v2624_v50 = vpop.permute.xlu1 %2623 }
 0xa78   : > { %v2739_v32 = vpop.permute.xlu0 %2738 }
 0xa7d   : > { %v2763_v34 = vpop.permute.xlu0 %2762 }
 0xac7   : > { %v2506_v16 = vpop.f32.mrb[40].mxu1 }
 0xac8   : > { %v3688_v17 = vpop.f32.mrb[41].mxu1 }
 0xac9   : > { %v2460_v2 = vpop.f32.mrb[36].mxu0  ;;  %v2509_v18 = vpop.f32.mrb[42].mxu1 }
 0xaca   : > { %v2608_v19 = vpack.c.bf16 %v2506_v16, %v2460_v2  ;;  %v3682_v20 = vpop.f32.mrb[37].mxu0  ;;  %v3689_v6 = vpop.f32.mrb[43].mxu1 }
 0xacb   : > { %v2463_v21 = vpop.f32.mrb[38].mxu0 }
 0xacc   : > { %v3683_v22 = vpop.f32.mrb[39].mxu0  ;;  %3702 = vmatprep.subr.bf16.mxu0 %v2608_v19 }
 0xacd   : > { %3703 = vmatpush3.bf16.msra.mxu0 %v2608_v19 }
 0xacf   : > { %v2598_v10 = vpop.f32.mrb[44].mxu1 }
 0xad0   : > { %v3700_v23 = vpop.f32.mrb[45].mxu1 }
 0xad1   : > { %v2552_v4 = vpop.f32.mrb[40].mxu0  ;;  %v2601_v24 = vpop.f32.mrb[46].mxu1 }
 0xad2   : > { %v2609_v12 = vpack.c.bf16 %v2598_v10, %v2552_v4  ;;  %v3694_v25 = vpop.f32.mrb[41].mxu0  ;;  %v3701_v27 = vpop.f32.mrb[47].mxu1 }
 0xad3   : > { %v2555_v28 = vpop.f32.mrb[42].mxu0  ;;  %v2743_v4 = vpop.permute.xlu1 %2742 }
 0xad4   : > { %v3695_v29 = vpop.f32.mrb[43].mxu0  ;;  %3704 = vmatprep.subr.bf16.mxu0 %v2609_v12 }
 0xad5   : > { %3705 = vmatpush3.bf16.msra.mxu0 %v2609_v12 }
 0xad7   : > { %v2759_v28 = vpop.permute.xlu1 %2758 }
 0xad8   : > { %3707 = vmatmul.mubr.msk.bf16.vlgmr.msra.gmra.mrb[44].mxu0 %vm940_vm1, %v3873_v30 }
 0xadb   : > { %v2747_v31 = vpop.permute.xlu1 %2746 }
 0xadf   : > { %v2751_v33 = vpop.permute.xlu1 %2750 }
 0xbab   : > { %v3708_v41 = vpop.f32.mrb[44].mxu0 }
 0xbac   : > { %v2676_v7 = vpop.f32.mrb[45].mxu0  ;;  %v2685_v48 = vadd.f32 %v3708_v41, %v2620_v46  ;;  %v2767_v46 = vpop.permute.xlu0 %2766 }
 0xbad   : > { %v2677_v49 = vadd.f32 %v2676_v7, %v2612_v45  ;;  %v3709_v9 = vpop.f32.mrb[46].mxu0  ;;  %v2771_v45 = vpop.permute.xlu1 %2770 }
 0xbae   : > { %v2679_v8 = vpop.f32.mrb[47].mxu0  ;;  %v2688_v52 = vadd.f32 %v3709_v9, %v2624_v50  ;;  %v2693_v11 = vadd.f32 %v2685_v48, %v4419_v39 }
 0xbaf   : > { %v2691_v51 = vadd.f32 %v2677_v49, %v4413_v36  ;;  %v2680_v53 = vadd.f32 %v2679_v8, %v2616_v47 }
 0xbb0   : > { %v2694_v56 = vadd.f32 %v2688_v52, %v4417_v38  ;;  %v2698_v59 = vsel %vm1176_vm4, %v2693_v11, 0.0 }
 0xbb1   : > { %v2692_v54 = vadd.f32 %v2680_v53, %v4415_v37  ;;  %v2695_v55 = vsel %vm1176_vm4, %v2691_v51, 0.0  ;;  %v3875_v53 = vld [vmem:[%s4240_s28 + $0x8] sm:$0xff]  }
 0xbb2   : > { %v2700_v14 = vsel %vm1176_vm4, %v2694_v56, 0.0 }
 0xbb3   : > { %v2696_v57 = vsel %vm1176_vm4, %v2692_v54, 0.0 }
 0xbb4   : > { %v2697_v58 = vadd.f32 %v2696_v57, %v2695_v55  ;;  %v3878_v55 = vld [vmem:[%s4250_s24] sm:$0xff]  }
 0xbb5   : > { %3730 = vmatprep.mubr.msk.bf16.mxu0 %vm2974_vm5, %v3878_v55  ;;  %v3918_v57 = vld [vmem:[%s4255_s17] sm:$0xff] }
 0xbb6   : > { %v2699_v60 = vadd.f32 %v2698_v59, %v2697_v58  ;;  %v3919_v58 = vld [vmem:[%s4255_s17 + $0x8] sm:$0xff]  ;;  %v3920_v59 = vld [vmem:[%s4255_s17 + $0x10] sm:$0xff] }
 0xbb8   : > { %v2701_v61 = vadd.f32 %v2700_v14, %v2699_v60  ;;  %v4028_v60 = vmov 8   ;;  %v3921_v14 = vld [vmem:[%s4255_s17 + $0x18] sm:$0xff] }
 0xbba   : > { %v2702_v36 = vrot.slane %v2701_v61, 4 }
 0xbbc   : > { %v2703_v5 = vadd.f32 %v2702_v36, %v2701_v61  ;;  %v4029_v61 = vmov 9   ;;  %v2803_v36 = vpop.permute.xlu1 %2802 }
 0xbbe   : > { %v2704_v62 = vrot.slane %v2703_v5, 2 }
 0xbc0   : > { %v2705_v63 = vadd.f32 %v2704_v62, %v2703_v5  ;;  %v2798_v5 = vpop.permute.xlu0 %2797  ;;  %v2808_v62 = vpop.permute.xlu1 %2807 }
 0xbc2   : > { %v2706_v39 = vrot.slane %v2705_v63, 1 }
 0xbc4   : > { %v2707_v0 = vadd.f32 %v2706_v39, %v2705_v63  ;;  %v2813_v63 = vpop.permute.xlu0 %2812 }
 0xbc6   : > { %v2708_v37 = vmul.f32 0.03125, %v2707_v0 }
 0xbc8   : > { %v2711_v1 = vsub.f32 %v2693_v11, %v2708_v37  ;;  %v2712_v15 = vsub.f32 %v2694_v56, %v2708_v37  ;;  %v2709_v13 = vsub.f32 %v2691_v51, %v2708_v37  ;;  %v2710_v38 = vsub.f32 %v2692_v54, %v2708_v37  ;;  %v3876_v11 = vld [vmem:[%s4240_s28 + $0x10] sm:$0xff]   ;;  %v3877_v54 = vld [vmem:[%s4240_s28 + $0x18] sm:$0xff]  }
 0xbc9   : > { %v4027_v56 = vmov 7  }
 0xbca   : > { %v2713_v26 = vmul.f32 %v2709_v13, %v2709_v13  ;;  %v2714_v3 = vmul.f32 %v2710_v38, %v2710_v38  ;;  %v2715_v16 = vmul.f32 %v2711_v1, %v2711_v1  ;;  %v2716_v17 = vmul.f32 %v2712_v15, %v2712_v15  ;;  %3850 = vset.pattern.permute.xlu1 %v4027_v56 }
 0xbcb   : > { %3851 = vset.pattern.permute.xlu0 %v4027_v56  ;;  %2949 = vperm.xlu1 %3850, %v3918_v57  }
 0xbcc   : > { %v2717_v2 = vsel %vm1176_vm4, %v2713_v26, 0.0  ;;  %v2718_v18 = vsel %vm1176_vm4, %v2714_v3, 0.0  ;;  %v2720_v20 = vsel %vm1176_vm4, %v2715_v16, 0.0  ;;  %v2722_v21 = vsel %vm1176_vm4, %v2716_v17, 0.0  ;;  %2953 = vperm.xlu0 %3851, %v3919_v58   ;;  %v2823_v3 = vpop.permute.xlu0 %2822 }
 0xbcd   : > { %v2719_v19 = vadd.f32 %v2718_v18, %v2717_v2 }
 0xbcf   : > { %v2721_v6 = vadd.f32 %v2720_v20, %v2719_v19  ;;  %2957 = vperm.xlu1 %3850, %v3920_v59  }
 0xbd0   : > { %3852 = vset.pattern.permute.xlu0 %v4028_v60 }
 0xbd1   : > { %v2723_v22 = vadd.f32 %v2722_v21, %v2721_v6  ;;  %3077 = vperm.xlu0 %3852, %v3918_v57  }
 0xbd3   : > { %v2724_v10 = vrot.slane %v2723_v22, 4  ;;  %2961 = vperm.xlu1 %3850, %v3921_v14  }
 0xbd5   : > { %v2725_v23 = vadd.f32 %v2724_v10, %v2723_v22  ;;  %3089 = vperm.xlu0 %3852, %v3921_v14  }
 0xbd7   : > { %v2726_v24 = vrot.slane %v2725_v23, 2  ;;  %3853 = vset.pattern.permute.xlu1 %v4028_v60 }
 0xbd8   : > { %3081 = vperm.xlu1 %3853, %v3919_v58  }
 0xbd9   : > { %v2727_v12 = vadd.f32 %v2726_v24, %v2725_v23  ;;  %3855 = vset.pattern.permute.xlu0 %v4029_v61 }
 0xbda   : > { %3101 = vperm.xlu0 %3855, %v3919_v58  }
 0xbdb   : > { %v2728_v25 = vrot.slane %v2727_v12, 1 }
 0xbdc   : > { %3085 = vperm.xlu1 %3853, %v3920_v59  }
 0xbdd   : > { %v2729_v27 = vadd.f32 %v2728_v25, %v2727_v12 }
 0xbdf   : > { %v2730_v29 = vmul.f32 0.03125, %v2729_v27 }
 0xbe0   : > { %3854 = vset.pattern.permute.xlu1 %v4029_v61 }
 0xbe1   : > { %v2731_v30 = vadd.f32 1e-05, %v2730_v29  ;;  %3097 = vperm.xlu1 %3854, %v3918_v57  }
 0xbe3   : > { %3914 = vrsqrt.f32 %v2731_v30 }
 0xbe5   : > { %3105 = vperm.xlu1 %3854, %v3920_v59  }
 0xbe9   : > { %3109 = vperm.xlu1 %3854, %v3921_v14  }
 0xbed   : > { %v3915_v35 = vpop.eup %3914 }
 0xbee   : > { %v2734_v40 = vmul.f32 %v3915_v35, %v2710_v38  ;;  %v2735_v42 = vmul.f32 %v3915_v35, %v2711_v1  ;;  %v2733_v43 = vmul.f32 %v3915_v35, %v2709_v13  ;;  %v2736_v44 = vmul.f32 %v3915_v35, %v2712_v15  ;;  %v2818_v1 = vpop.permute.xlu1 %2817  ;;  %v3879_v35 = vld [vmem:[%s4250_s24 + $0x8] sm:$0xff]  }
 0xbf0   : > { %v2754_v41 = vmul.f32 %v2743_v4, %v2734_v40  ;;  %v2755_v7 = vmul.f32 %v2747_v31, %v2735_v42  ;;  %v2753_v47 = vmul.f32 %v2739_v32, %v2733_v43  ;;  %v2756_v48 = vmul.f32 %v2751_v33, %v2736_v44  ;;  %v2833_v4 = vpop.permute.xlu0 %2832 }
 0xbf2   : > { %v4537_v49 = vadd.f32 %v2759_v28, %v2753_v47  ;;  %v4539_v9 = vadd.f32 %v2763_v34, %v2754_v41  ;;  %v4541_v50 = vadd.f32 %v2771_v45, %v2756_v48  ;;  %v4543_v8 = vadd.f32 %v2767_v46, %v2755_v7  ;;  %v2828_v21 = vpop.permute.xlu1 %2827 }
 0xbf4   : > { %v2785_v51 = vpack.c.bf16 %v4539_v9, %v4537_v49  ;;  %v2786_v52 = vpack.c.bf16 %v4541_v50, %v4543_v8 }
 0xbf6   : > { %3710 = vmatprep.subr.bf16.mxu1 %v2785_v51 }
 0xbf7   : > { %3711 = vmatpush3.bf16.msra.mxu1 %v2785_v51 }
 0xbf8   : > { %3712 = vmatprep.subr.bf16.mxu1 %v2786_v52 }
 0xbfb   : > { %3713 = vmatpush3.bf16.msra.mxu1 %v2786_v52 }
 0xbfe   : > { %3715 = vmatmul.mubr.msk.bf16.vlgmr.msra.gmra.mrb[48].mxu1 %vm940_vm1, %v3875_v53 }
 0xbff   : > { %3718 = vmatprep.mubr.msk.bf16.mxu1 %vm940_vm1, %v3876_v11 }
 0xc06   : > { %3719 = vmatmul.mubr.msk.bf16.gmra.mrb[52].mxu1 %vm940_vm1, %v3877_v54 }
 0xc4a   : > { %v2950_v40 = vpop.permute.xlu1 %2949 }
 0xc4b   : > { %v2954_v45 = vpop.permute.xlu0 %2953 }
 0xc4e   : > { %v2958_v42 = vpop.permute.xlu1 %2957 }
 0xc52   : > { %v2962_v47 = vpop.permute.xlu1 %2961 }
 0xcd1   : > { %v3716_v39 = vpop.f32.mrb[48].mxu1 }
 0xcd2   : > { %v2910_v0 = vadd.f32 %v3716_v39, %v2808_v62  ;;  %v2901_v37 = vpop.f32.mrb[49].mxu1 }
 0xcd3   : > { %v2902_v15 = vadd.f32 %v2901_v37, %v2798_v5  ;;  %v3717_v13 = vpop.f32.mrb[50].mxu1 }
 0xcd4   : > { %v2913_v38 = vadd.f32 %v3717_v13, %v2813_v63  ;;  %v2904_v26 = vpop.f32.mrb[51].mxu1  ;;  %v2934_v17 = vmax.f32 %v2910_v0, 0.0 }
 0xcd5   : > { %v2905_v16 = vadd.f32 %v2904_v26, %v2803_v36  ;;  %v2932_v18 = vmax.f32 %v2902_v15, 0.0 }
 0xcd6   : > { %v2935_v2 = vmax.f32 %v2913_v38, 0.0 }
 0xcd7   : > { %v2933_v19 = vmax.f32 %v2905_v16, 0.0 }
 0xcd8   : > { %v2945_v20 = vpack.c.bf16 %v2935_v2, %v2934_v17 }
 0xcd9   : > { %v2944_v6 = vpack.c.bf16 %v2933_v19, %v2932_v18  ;;  %v3720_v22 = vpop.f32.mrb[52].mxu1 }
 0xcda   : > { %v2926_v10 = vadd.f32 %v3720_v22, %v2828_v21  ;;  %v2917_v23 = vpop.f32.mrb[53].mxu1  ;;  %v3082_v22 = vpop.permute.xlu1 %3081 }
 0xcdb   : > { %v2918_v24 = vadd.f32 %v2917_v23, %v2818_v1  ;;  %v3721_v12 = vpop.f32.mrb[54].mxu1  ;;  %3722 = vmatprep.subr.bf16.mxu0 %v2944_v6 }
 0xcdc   : > { %v2929_v25 = vadd.f32 %v3721_v12, %v2833_v4  ;;  %v2920_v27 = vpop.f32.mrb[55].mxu1  ;;  %3723 = vmatpush3.bf16.msra.mxu0 %v2944_v6  ;;  %v2938_v29 = vmax.f32 %v2926_v10, 0.0 }
 0xcdd   : > { %v2921_v28 = vadd.f32 %v2920_v27, %v2823_v3  ;;  %3724 = vmatprep.subr.bf16.mxu0 %v2945_v20  ;;  %v2936_v31 = vmax.f32 %v2918_v24, 0.0 }
 0xcde   : > { %v2939_v30 = vmax.f32 %v2929_v25, 0.0  ;;  %v3086_v12 = vpop.permute.xlu1 %3085 }
 0xcdf   : > { %v2937_v32 = vmax.f32 %v2921_v28, 0.0  ;;  %v3078_v28 = vpop.permute.xlu0 %3077 }
 0xce0   : > { %v2947_v33 = vpack.c.bf16 %v2939_v30, %v2938_v29  ;;  %3725 = vmatpush3.bf16.msra.mxu0 %v2945_v20 }
 0xce1   : > { %v2946_v34 = vpack.c.bf16 %v2937_v32, %v2936_v31 }
 0xce2   : > { %v3098_v27 = vpop.permute.xlu1 %3097 }
 0xce3   : > { %3726 = vmatprep.subr.bf16.mxu0 %v2946_v34  ;;  %v3090_v30 = vpop.permute.xlu0 %3089 }
 0xce4   : > { %3727 = vmatpush3.bf16.msra.mxu0 %v2946_v34 }
 0xce5   : > { %3728 = vmatprep.subr.bf16.mxu0 %v2947_v33 }
 0xce6   : > { %v3106_v29 = vpop.permute.xlu1 %3105 }
 0xce8   : > { %3729 = vmatpush3.bf16.msra.mxu0 %v2947_v33 }
 0xceb   : > { %3731 = vmatmul.mubr.msk.bf16.vlgmr.msra.gmra.mrb[48].mxu0 %vm2974_vm5, %v3879_v35 }
 0xdbe   : > { %v3732_v43 = vpop.f32.mrb[48].mxu0 }
 0xdbf   : > { %v3015_v44 = vpop.f32.mrb[49].mxu0  ;;  %v3024_v46 = vadd.f32 %v3732_v43, %v2958_v42 }
 0xdc0   : > { %v3016_v41 = vadd.f32 %v3015_v44, %v2950_v40  ;;  %v3733_v7 = vpop.f32.mrb[50].mxu0  ;;  %v3102_v40 = vpop.permute.xlu0 %3101 }
 0xdc1   : > { %v3018_v48 = vpop.f32.mrb[51].mxu0  ;;  %v3027_v52 = vadd.f32 %v3733_v7, %v2962_v47  ;;  %v3032_v11 = vadd.f32 %v3024_v46, %v4543_v8  ;;  %v3110_v46 = vpop.permute.xlu1 %3109 }
 0xdc2   : > { %v3030_v51 = vadd.f32 %v3016_v41, %v4537_v49  ;;  %v3019_v53 = vadd.f32 %v3018_v48, %v2954_v45 }
 0xdc3   : > { %v3033_v56 = vadd.f32 %v3027_v52, %v4541_v50  ;;  %v3037_v59 = vsel %vm1176_vm4, %v3032_v11, 0.0 }
 0xdc4   : > { %v3031_v54 = vadd.f32 %v3019_v53, %v4539_v9  ;;  %v3034_v55 = vsel %vm1176_vm4, %v3030_v51, 0.0 }
 0xdc5   : > { %v3039_v14 = vsel %vm1176_vm4, %v3033_v56, 0.0 }
 0xdc6   : > { %v3035_v57 = vsel %vm1176_vm4, %v3031_v54, 0.0 }
 0xdc7   : > { %v3036_v58 = vadd.f32 %v3035_v57, %v3034_v55 }
 0xdc9   : > { %v3038_v60 = vadd.f32 %v3037_v59, %v3036_v58 }
 0xdcb   : > { %v3040_v61 = vadd.f32 %v3039_v14, %v3038_v60 }
 0xdcd   : > { %v3041_v49 = vrot.slane %v3040_v61, 4 }
 0xdcf   : > { %v3042_v36 = vadd.f32 %v3041_v49, %v3040_v61 }
 0xdd1   : > { %v3043_v5 = vrot.slane %v3042_v36, 2 }
 0xdd3   : > { %v3044_v62 = vadd.f32 %v3043_v5, %v3042_v36 }
 0xdd5   : > { %v3045_v8 = vrot.slane %v3044_v62, 1 }
 0xdd7   : > { %v3046_v63 = vadd.f32 %v3045_v8, %v3044_v62 }
 0xdd9   : > { %v3047_v9 = vmul.f32 0.03125, %v3046_v63 }
 0xddb   : > { %v3050_v39 = vsub.f32 %v3032_v11, %v3047_v9  ;;  %v3051_v0 = vsub.f32 %v3033_v56, %v3047_v9  ;;  %v3048_v37 = vsub.f32 %v3030_v51, %v3047_v9  ;;  %v3049_v50 = vsub.f32 %v3031_v54, %v3047_v9 }
 0xddd   : > { %v3052_v1 = vmul.f32 %v3048_v37, %v3048_v37  ;;  %v3053_v15 = vmul.f32 %v3049_v50, %v3049_v50  ;;  %v3054_v13 = vmul.f32 %v3050_v39, %v3050_v39  ;;  %v3055_v38 = vmul.f32 %v3051_v0, %v3051_v0 }
 0xddf   : > { %v3056_v26 = vsel %vm1176_vm4, %v3052_v1, 0.0  ;;  %v3057_v3 = vsel %vm1176_vm4, %v3053_v15, 0.0  ;;  %v3059_v17 = vsel %vm1176_vm4, %v3054_v13, 0.0  ;;  %v3061_v18 = vsel %vm1176_vm4, %v3055_v38, 0.0 }
 0xde0   : > { %v3058_v16 = vadd.f32 %v3057_v3, %v3056_v26 }
 0xde2   : > { %v3060_v2 = vadd.f32 %v3059_v17, %v3058_v16 }
 0xde4   : > { %v3062_v19 = vadd.f32 %v3061_v18, %v3060_v2 }
 0xde6   : > { %v3063_v20 = vrot.slane %v3062_v19, 4 }
 0xde8   : > { %v3064_v6 = vadd.f32 %v3063_v20, %v3062_v19 }
 0xdea   : > { %v3065_v21 = vrot.slane %v3064_v6, 2 }
 0xdec   : > { %v3066_v10 = vadd.f32 %v3065_v21, %v3064_v6 }
 0xdee   : > { %v3067_v23 = vrot.slane %v3066_v10, 1 }
 0xdf0   : > { %v3068_v4 = vadd.f32 %v3067_v23, %v3066_v10 }
 0xdf2   : > { %v3069_v24 = vmul.f32 0.03125, %v3068_v4 }
 0xdf4   : > { %v3070_v25 = vadd.f32 1e-05, %v3069_v24 }
 0xdf6   : > { %3916 = vrsqrt.f32 %v3070_v25 }
 0xe00   : > { %v3917_v31 = vpop.eup %3916 }
 0xe01   : > { %v3073_v32 = vmul.f32 %v3917_v31, %v3049_v50  ;;  %v3074_v33 = vmul.f32 %v3917_v31, %v3050_v39  ;;  %v3072_v34 = vmul.f32 %v3917_v31, %v3048_v37  ;;  %v3075_v35 = vmul.f32 %v3917_v31, %v3051_v0 }
 0xe02   : > { %3123 = sbr.rel (%p3477_p1) target bundleno = 3721 (0xe89), region = 92 }
 0xe03   : > { %v3093_v42 = vmul.f32 %v3082_v22, %v3073_v32  ;;  %v3094_v43 = vmul.f32 %v3086_v12, %v3074_v33  ;;  %v3092_v44 = vmul.f32 %v3078_v28, %v3072_v34  ;;  %v3095_v45 = vmul.f32 %v3090_v30, %v3075_v35 }
 0xe05   : > { %v3112_v41 = vadd.f32 %v3098_v27, %v3092_v44  ;;  %v3114_v7 = vadd.f32 %v3106_v29, %v3094_v43  ;;  %v3115_v47 = vadd.f32 %v3110_v46, %v3095_v45  ;;  %v3113_v48 = vadd.f32 %v3102_v40, %v3093_v42 }
 0xe07   : > { %3116 = vst.msk [vmem:[#allocation2] sm:$0xff] %vm1176_vm4, %v3112_v41  ;;  %3118 = vst.msk [vmem:[#allocation2 + $0x10] sm:$0xff] %vm1176_vm4, %v3114_v7  ;;  %3124 = vxpose.xlu0.b32.start [1/4] (short) (narrow) (!%p3477_p1), %v3112_v41, 8 }
 0xe08   : > { %3119 = vst.msk [vmem:[#allocation2 + $0x18] sm:$0xff] %vm1176_vm4, %v3115_v47  ;;  %3117 = vst.msk [vmem:[#allocation2 + $0x8] sm:$0xff] %vm1176_vm4, %v3113_v48 }
 0xe0b   : > { %3125 = vxpose.xlu0.b32.cont [2/4] (short) (narrow) %v3113_v48, 8 }
 0xe0f   : > { %3126 = vxpose.xlu0.b32.cont [3/4] (short) (narrow) %v3114_v7, 8 }
 0xe13   : > { %3127 = vxpose.xlu0.b32.end [4/4] (short) (narrow) %v3115_v47, 8 }
 0xe87   : > { %v3140_v51 = vpop.trf.xlu0 }
 0xe88   : > { %3156 = vst.msk [vmem:[%s704_s10] sm:$0xff] %vm940_vm1, %v3140_v51 }
 0xe89 PF: > { %s4714_s23 = sld [smem:[#allocation10_spill]]  ;;  %s4715_s25 = sld [smem:[#allocation7_spill]] }
 0xe8a   : > { %s4717_s30 = sld [smem:[#allocation32_spill]]  ;;  %s3171_s28 = sshll.u32 %s704_s10, 4  ;;  %s3172_s28 = int_to_ptr.vmem [resolvable:$true] %s3171_s28 }
 0xe8b   : > { %s3922_s21 = scalar_lea.vmem %s3172_s28, 128  ;;  %s4030_s24 = smov [#allocation3]  }
 0xe8c   : > { %p3923_p2 = scmp.ne.s32.totalorder %s3172_s28, %s3922_s21  ;;  %s3926_s4 = sshll.u32 %s4030_s24, 4  ;;  %s3927_s4 = int_to_ptr.vmem [resolvable:$false] %s3926_s4 }
 0xe8d   : > { %s3928_s0 = scalar_lea.vmem %s3927_s4, 256  ;;  %p3929_p6 = scmp.lt.s32.totalorder %s3172_s28, %s3927_s4 }
 0xe8e   : > { %p3924_p4 = pnand %p3923_p2, %p4165_p3  ;;  %p3930_p7 = scmp.lt.s32.totalorder %s3928_s0, %s3922_s21 }
 0xe8f   : > { %s3479_s16 = sshll.u32 %s4714_s23, 7  ;;  %s4718_s1 = sand.u32 1, %s4715_s25  }
 0xe90   : > { %s4587_s19 = scalar_lea.hbm %s4717_s30, %s3479_s16  ;;  %s3158_s2 = scalar_lea.sflag [#allocation4], %s4718_s1 }
 0xe91   : > { %p3925_p5 = pneg %p3924_p4  ;;  %p3931_p8 = por %p3930_p7, %p3929_p6 }
 0xe93   : > { %p3932_p10 = pnand %p3931_p8, %p3925_p5 }
 0xe95   : > { %3935 = shalt.err (!%p3932_p10)
}
 0xe96   : > { %s3936_s10 = scalar_lea.hbm %s4587_s19, 128  ;;  %s3940_s27 = scalar_lea.hbm %s4717_s30, 256 }
 0xe97   : > { %p3937_p11 = scmp.ne.s32.totalorder %s4587_s19, %s3936_s10  ;;  %p3941_p0 = scmp.lt.u32.totalorder %s4587_s19, %s4717_s30 }
 0xe98   : > { %p3942_p1 = scmp.lt.u32.totalorder %s3940_s27, %s3936_s10  ;;  %p3944_p4 = scmp.lt.u32.totalorder %s3936_s10, %s4587_s19 }
 0xe99   : > { %p3938_p12 = pnand %p3937_p11, %p4165_p3 }
 0xe9a   : > { %p3943_p2 = por %p3942_p1, %p3941_p0 }
 0xe9b   : > { %p3939_p13 = pneg %p3938_p12 }
 0xe9c   : > { %p3945_p5 = por %p3944_p4, %p3943_p2 }
 0xe9e   : > { %p3946_p6 = pnand %p3945_p5, %p3939_p13 }
 0xea0   : > { %3949 = shalt.err (!%p3946_p6)
}
 0xea1   : > { %3736 = dma.vmem_to_hbm [thread:$0]  (%p4165_p3), %s3172_s28, 128, %s4587_s19, %s3158_s2  }
 0xea2 PF: > { %s4719_s3 = sld [smem:[#allocation13_spill]]  ;;  %s4720_s7 = sld [smem:[#allocation6_spill]] }
 0xea8   : > { %p3742_p7 = scmp.ge.s32.totalorder %s4719_s3, 2  ;;  %s3183_s9 = sand.u32 1, %s4720_s7  }
 0xea9   : > { %s3184_s11 = scalar_lea.sflag [#allocation4], %s3183_s9 }
 0xeaa   : > { %p3739_p8 = pnand %p3742_p7, %p4175_p9 }
 0xeac   : > { %3983 = dma.done.wait (!%p3739_p8), %s3184_s11, 128  }
 0xead   : > { %3985 = vsyncadd (!%p3739_p8), %s3184_s11, 4294967168  ;;  %s29_s28 = sadd.s32 1, %s4719_s3   ;;  %s4722_s21 = sld [smem:[#allocation7_spill]] }
 0xeae   : > { %p26_p10 = scmp.ge.s32.totalorder %s29_s28, 6   ;;  %s4723_s22 = sld [smem:[#allocation8_spill]] }
 0xeaf   : > { %s4724_s23 = sld [smem:[#allocation18_spill]]  ;;  %s4725_s24 = sld [smem:[#allocation11_spill]] }
 0xeb0   : > { %s4726_s25 = sld [smem:[#allocation12_spill]]  ;;  %s4727_s26 = sld [smem:[#allocation14_spill]] }
 0xeb1   : > { %s4728_s27 = sld [smem:[#allocation16_spill]]  ;;  %28 = sbr.rel (!%p26_p10) target bundleno = 20 (0x14), region = 163 }
 0xeb8   :  { %3189 = vsyncpa [#allocation4], 1 }
 0xeb9   :  { %3191 = vsyncpa [#allocation4 + $0x1], 1 }

</bundles_post_ra>
